<compile_context>
chip_gen: v7x
topology: tpu7x:2x2x1
jax: 0.10.0
libtpu: 0.0.40
codegen_flags: <defaults>
</compile_context>

<pallas_src>
import functools

import jax
import jax.numpy as jnp
from jax import lax
from jax.experimental import pallas as pl
from jax.experimental.pallas import tpu as pltpu


def _vmem_limit_bytes():
    """Generation-aware scoped-VMEM limit (v7x: 64 MiB physical; v5e/v6e: 128 MiB)."""
    try:
        cap = pltpu.get_tpu_info().vmem_capacity_bytes
    except Exception:
        cap = 64 * 1024 * 1024  # conservative (v7x-sized) fallback
    # ~20% headroom for compiler-internal scratch; never above 100 MB.
    return min(int(cap * 4 // 5), 100 * 1024 * 1024)


# ----------------------------- kernel -----------------------------------------


def _layernorm(v, w, b, eps=1e-5):
    # Single pass: mean and mean-of-squares reduce the same input (no dependency
    # between the two XLU lane reductions).
    mu = jnp.mean(v, axis=-1, keepdims=True)
    var = jnp.mean(v * v, axis=-1, keepdims=True) - mu * mu
    return (v - mu) * lax.rsqrt(var + eps) * w + b


def _text_encoder_kernel(
    mask_ref,                      # (S, S) additive causal mask, f32 (precomputed)
    x_ref,                         # (1, S, D) f32 embedded input (read at l==0)
    ln1w, ln1b,                    # (1, 1, D) f32 each (layer l slice)
    wq, bq, wk, bk, wv, bv, wo, bo,  # (1, D, D) bf16 / (1, 1, D) f32
    ln2w, ln2b,                    # (1, 1, D) f32
    w1, b1, w2, b2,                # (1, D, F) bf16, (1, 1, F) f32, (1, F, D) bf16, (1, 1, D) f32
    flnw, flnb,                    # (1, D) f32 final LayerNorm params (constant)
    o_ref,                         # (1, S, D) f32 output (written at l==L-1)
    carry_ref,                     # (1, S, D) f32 VMEM scratch: activation carry
    *, num_heads: int,
):
    l = pl.program_id(1)

    @pl.when(l == 0)
    def _():
        carry_ref[...] = x_ref[...]

    x = carry_ref[0]                                   # (S, D) f32
    S, D = x.shape
    H = num_heads
    hd = D // H
    scale = float(hd) ** -0.5

    # ---- pre-LN + causal multi-head self-attention (heads batched) ----------
    h = _layernorm(x, ln1w[0], ln1b[0])
    hb = h.astype(jnp.bfloat16)                        # bf16 MXU feed, f32 accum

    q = jnp.dot(hb, wq[0], preferred_element_type=jnp.float32) + bq[0]
    k = jnp.dot(hb, wk[0], preferred_element_type=jnp.float32) + bk[0]
    v = jnp.dot(hb, wv[0], preferred_element_type=jnp.float32) + bv[0]

    # cast to bf16 BEFORE the head transposes (halves relayout traffic)
    q3 = jnp.transpose((q * scale).astype(jnp.bfloat16).reshape(S, H, hd), (1, 0, 2))
    k3 = jnp.transpose(k.astype(jnp.bfloat16).reshape(S, H, hd), (1, 0, 2))
    v3 = jnp.transpose(v.astype(jnp.bfloat16).reshape(S, H, hd), (1, 0, 2))

    # batched scores; contraction over last dims -> no explicit K transpose
    s = jnp.einsum("hqd,hkd->hqk", q3, k3,
                   preferred_element_type=jnp.float32)         # (H, S, S) f32
    s = s + mask_ref[...][None, :, :]
    s = s - jnp.max(s, axis=-1, keepdims=True)
    p = jnp.exp(s)
    p = p * pl.reciprocal(jnp.sum(p, axis=-1, keepdims=True), approx=True)

    o_h = jnp.einsum("hqk,hkd->hqd", p.astype(jnp.bfloat16), v3,
                     preferred_element_type=jnp.float32)       # (H, S, hd)
    attn = jnp.transpose(o_h.astype(jnp.bfloat16), (1, 0, 2)).reshape(S, D)
    attn = jnp.dot(attn, wo[0], preferred_element_type=jnp.float32) + bo[0]

    # dropout p=0.0 -> identity
    x1 = x + attn

    # ---- pre-LN FFN with QuickGELU (lane-dense F and D outputs) --------------
    h2 = _layernorm(x1, ln2w[0], ln2b[0])
    f = jnp.dot(h2.astype(jnp.bfloat16), w1[0],
                preferred_element_type=jnp.float32) + b1[0]
    f = f * jax.nn.sigmoid(1.702 * f)                  # QuickGELU in f32
    f = jnp.dot(f.astype(jnp.bfloat16), w2[0],
                preferred_element_type=jnp.float32) + b2[0]

    y = x1 + f
    carry_ref[0] = y

    # fused final LayerNorm on the last layer step; single HBM writeback per b
    @pl.when(l == pl.num_programs(1) - 1)
    def _():
        o_ref[0] = _layernorm(y, flnw[...], flnb[...])


# ----------------------------- wrapper -----------------------------------------


_STACK_KEYS = ("ln1w", "ln1b", "wq", "bq", "wk", "bk", "wv", "bv", "wo", "bo",
               "ln2w", "ln2b", "w1", "b1", "w2", "b2")


def encoder_stack(x, mask, stack, fln_w, fln_b, num_heads):
    """All L transformer layers + final LN in one pallas_call.

    x: (B, S, D) f32; mask: (S, S) f32; stack[k]: (L, ...) stacked layer params.
    """
    B, S, D = x.shape
    L = stack["wq"].shape[0]
    kernel = functools.partial(_text_encoder_kernel, num_heads=num_heads)

    stacked = [stack[k] for k in _STACK_KEYS]

    def layer_spec(p):
        rest = p.shape[1:]
        # block (1, ...) over the layer axis -> pipeline prefetches layer l+1
        return pl.BlockSpec((1,) + rest,
                            lambda b, l, _n=len(rest): (l,) + (0,) * _n)

    param_specs = [layer_spec(p) for p in stacked]

    return pl.pallas_call(
        kernel,
        out_shape=jax.ShapeDtypeStruct((B, S, D), jnp.float32),
        grid_spec=pltpu.PrefetchScalarGridSpec(
            num_scalar_prefetch=0,
            grid=(B, L),                                  # b outer, layer inner
            in_specs=[pl.BlockSpec((S, S), lambda b, l: (0, 0)),        # mask
                      pl.BlockSpec((1, S, D), lambda b, l: (b, 0, 0))]  # x
                     + param_specs
                     + [pl.BlockSpec((1, D), lambda b, l: (0, 0)),      # final LN w
                        pl.BlockSpec((1, D), lambda b, l: (0, 0))],     # final LN b
            out_specs=pl.BlockSpec((1, S, D), lambda b, l: (b, 0, 0)),
            scratch_shapes=[pltpu.VMEM((1, S, D), jnp.float32)],        # carry
        ),
        compiler_params=pltpu.CompilerParams(
            dimension_semantics=("parallel", "arbitrary"),
            vmem_limit_bytes=_vmem_limit_bytes(),
        ),
    )(mask, x, *stacked, fln_w, fln_b)


def text_encoder_forward(input_ids, params, num_heads):
    """input_ids: (B, S) int32 -> (B, S, D) f32."""
    B, S = input_ids.shape
    tok_table = params["token_embedding"]        # (V, D)
    pos_table = params["position_embedding"]     # (max_len, D)
    # embedding lookup (gather) kept in plain JAX (glue).
    x = jnp.take(tok_table, input_ids, axis=0).astype(jnp.float32)
    x = x + pos_table[:S].astype(jnp.float32)[None, :, :]

    # pad S to a sublane multiple (8); causal mask excludes padded keys for all
    # real query rows; padded rows are garbage and sliced off at the end.
    s_pad = -(-S // 8) * 8
    if s_pad != S:
        x = jnp.pad(x, ((0, 0), (0, s_pad - S), (0, 0)))

    # additive causal mask, built once (hoisted out of the kernel).
    row = lax.broadcasted_iota(jnp.int32, (s_pad, s_pad), 0)
    col = lax.broadcasted_iota(jnp.int32, (s_pad, s_pad), 1)
    mask = jnp.where(col <= row, 0.0, -1e30).astype(jnp.float32)

    out = encoder_stack(x, mask, params["stack"],
                        params["final_ln_w"], params["final_ln_b"], num_heads)
    return out[:, :S, :]


# ----------------------------- parameter init ----------------------------------


def init_params(key, n_vocab, embed_dim, max_len, ffn_dim, num_layers, num_heads):
    assert embed_dim % num_heads == 0, "embed_dim must be divisible by num_heads"
    D, F, L = embed_dim, ffn_dim, num_layers
    keys = jax.random.split(key, 8)

    def w(k, shape):
        # matmul weights in bf16 (halves HBM/VMEM traffic, bf16-native MXU);
        # biases / LayerNorm params stay f32.
        return (0.02 * jax.random.normal(k, shape, jnp.float32)).astype(jnp.bfloat16)

    stack = {
        "ln1w": jnp.ones((L, 1, D), jnp.float32),
        "ln1b": jnp.zeros((L, 1, D), jnp.float32),
        "wq": w(keys[2], (L, D, D)), "bq": jnp.zeros((L, 1, D), jnp.float32),
        "wk": w(keys[3], (L, D, D)), "bk": jnp.zeros((L, 1, D), jnp.float32),
        "wv": w(keys[4], (L, D, D)), "bv": jnp.zeros((L, 1, D), jnp.float32),
        "wo": w(keys[5], (L, D, D)), "bo": jnp.zeros((L, 1, D), jnp.float32),
        "ln2w": jnp.ones((L, 1, D), jnp.float32),
        "ln2b": jnp.zeros((L, 1, D), jnp.float32),
        "w1": w(keys[6], (L, D, F)), "b1": jnp.zeros((L, 1, F), jnp.float32),
        "w2": w(keys[7], (L, F, D)), "b2": jnp.zeros((L, 1, D), jnp.float32),
    }
    return {
        "token_embedding": 0.02 * jax.random.normal(keys[0], (n_vocab, D), jnp.float32),
        "position_embedding": 0.02 * jax.random.normal(keys[1], (max_len, D), jnp.float32),
        "final_ln_w": jnp.ones((1, D), jnp.float32),
        "final_ln_b": jnp.zeros((1, D), jnp.float32),
        "stack": stack,
    }


# ----------------------------- main ---------------------------------------------


if __name__ == "__main__":
    # Small, TPU-tile-friendly configuration consistent with the module structure
    # (real CLIP: n_vocab=49408, D=768, 12 layers, 12 heads, max_len=77).
    N_VOCAB, EMBED_DIM, MAX_LEN = 128, 128, 16
    NUM_HEADS, FFN_DIM, NUM_LAYERS = 4, 512, 2
    B, S = 2, 8

    key = jax.random.PRNGKey(0)
    pkey, ikey = jax.random.split(key)
    params = init_params(pkey, N_VOCAB, EMBED_DIM, MAX_LEN, FFN_DIM, NUM_LAYERS, NUM_HEADS)
    input_ids = jax.random.randint(ikey, (B, S), 0, N_VOCAB, dtype=jnp.int32)

    out = text_encoder_forward(input_ids, params, NUM_HEADS)
    out = jax.block_until_ready(out)
    assert out.shape == (B, S, EMBED_DIM) and out.dtype == jnp.float32
    assert bool(jnp.all(jnp.isfinite(out)))
    print("KERNEL_OK")
</pallas_src>

<mosaic_0001>
module attributes {stable_mosaic.version = 11 : i64} {
  func.func @_text_encoder_kernel(%arg0: i32, %arg1: i32, %arg2: memref<8x8xf32, #tpu.memory_space<vmem>>, %arg3: memref<1x8x128xf32, #tpu.memory_space<vmem>>, %arg4: memref<1x1x128xf32, #tpu.memory_space<vmem>>, %arg5: memref<1x1x128xf32, #tpu.memory_space<vmem>>, %arg6: memref<1x128x128xbf16, #tpu.memory_space<vmem>>, %arg7: memref<1x1x128xf32, #tpu.memory_space<vmem>>, %arg8: memref<1x128x128xbf16, #tpu.memory_space<vmem>>, %arg9: memref<1x1x128xf32, #tpu.memory_space<vmem>>, %arg10: memref<1x128x128xbf16, #tpu.memory_space<vmem>>, %arg11: memref<1x1x128xf32, #tpu.memory_space<vmem>>, %arg12: memref<1x128x128xbf16, #tpu.memory_space<vmem>>, %arg13: memref<1x1x128xf32, #tpu.memory_space<vmem>>, %arg14: memref<1x1x128xf32, #tpu.memory_space<vmem>>, %arg15: memref<1x1x128xf32, #tpu.memory_space<vmem>>, %arg16: memref<1x128x512xbf16, #tpu.memory_space<vmem>>, %arg17: memref<1x1x512xf32, #tpu.memory_space<vmem>>, %arg18: memref<1x512x128xbf16, #tpu.memory_space<vmem>>, %arg19: memref<1x1x128xf32, #tpu.memory_space<vmem>>, %arg20: memref<1x128xf32, #tpu.memory_space<vmem>>, %arg21: memref<1x128xf32, #tpu.memory_space<vmem>>, %arg22: memref<1x8x128xf32, #tpu.memory_space<vmem>>, %arg23: memref<1x8x128xf32, #tpu.memory_space<vmem>>) attributes {dimension_semantics = [#tpu.dimension_semantics<parallel>, #tpu.dimension_semantics<arbitrary>], iteration_bounds = array<i64: 2, 2>, scalar_prefetch = 0 : i64, scratch_operands = 1 : i64, tpu.core_type = #tpu.core_type<tc>, window_params = [{pipeline_mode = #tpu.pipeline_mode<synchronous>, transform_indices = @transform_0, window_bounds = array<i64: 8, 8>}, {transform_indices = @transform_1, window_bounds = array<i64: 1, 8, 128>}, {transform_indices = @transform_2, window_bounds = array<i64: 1, 1, 128>}, {transform_indices = @transform_3, window_bounds = array<i64: 1, 1, 128>}, {transform_indices = @transform_4, window_bounds = array<i64: 1, 128, 128>}, {transform_indices = @transform_5, window_bounds = array<i64: 1, 1, 128>}, {transform_indices = @transform_6, window_bounds = array<i64: 1, 128, 128>}, {transform_indices = @transform_7, window_bounds = array<i64: 1, 1, 128>}, {transform_indices = @transform_8, window_bounds = array<i64: 1, 128, 128>}, {transform_indices = @transform_9, window_bounds = array<i64: 1, 1, 128>}, {transform_indices = @transform_10, window_bounds = array<i64: 1, 128, 128>}, {transform_indices = @transform_11, window_bounds = array<i64: 1, 1, 128>}, {transform_indices = @transform_12, window_bounds = array<i64: 1, 1, 128>}, {transform_indices = @transform_13, window_bounds = array<i64: 1, 1, 128>}, {transform_indices = @transform_14, window_bounds = array<i64: 1, 128, 512>}, {transform_indices = @transform_15, window_bounds = array<i64: 1, 1, 512>}, {transform_indices = @transform_16, window_bounds = array<i64: 1, 512, 128>}, {transform_indices = @transform_17, window_bounds = array<i64: 1, 1, 128>}, {pipeline_mode = #tpu.pipeline_mode<synchronous>, transform_indices = @transform_18, window_bounds = array<i64: 1, 128>}, {pipeline_mode = #tpu.pipeline_mode<synchronous>, transform_indices = @transform_19, window_bounds = array<i64: 1, 128>}, {transform_indices = @transform_20, window_bounds = array<i64: 1, 8, 128>}]} {
    %c0_i32 = arith.constant 0 : i32
    %0 = arith.cmpi eq, %arg1, %c0_i32 : i32
    %1 = arith.extui %0 : i1 to i32
    %c0_i32_0 = arith.constant 0 : i32
    %2 = arith.cmpi ne, %1, %c0_i32_0 : i32
    scf.if %2 {
      %c0_79 = arith.constant 0 : index
      %c0_80 = arith.constant 0 : index
      %c0_81 = arith.constant 0 : index
      %149 = vector.load %arg3[%c0_79, %c0_80, %c0_81] : memref<1x8x128xf32, #tpu.memory_space<vmem>>, vector<1x8x128xf32>
      %c0_82 = arith.constant 0 : index
      %c0_83 = arith.constant 0 : index
      %c0_84 = arith.constant 0 : index
      %150 = vector.load %arg23[%c0_82, %c0_83, %c0_84] : memref<1x8x128xf32, #tpu.memory_space<vmem>>, vector<1x8x128xf32>
      tpu.vector_store %arg23[%c0_82, %c0_83, %c0_84], %149 {strides = array<i32>} : memref<1x8x128xf32, #tpu.memory_space<vmem>>, vector<1x8x128xf32>,
    } else {
    }
    %c0 = arith.constant 0 : index
    %c0_1 = arith.constant 0 : index
    %c0_2 = arith.constant 0 : index
    %3 = vector.load %arg23[%c0, %c0_1, %c0_2] : memref<1x8x128xf32, #tpu.memory_space<vmem>>, vector<1x8x128xf32>
    %4 = vector.shape_cast %3 : vector<1x8x128xf32> to vector<8x128xf32>
    %c0_3 = arith.constant 0 : index
    %c0_4 = arith.constant 0 : index
    %c0_5 = arith.constant 0 : index
    %5 = vector.load %arg4[%c0_3, %c0_4, %c0_5] : memref<1x1x128xf32, #tpu.memory_space<vmem>>, vector<1x1x128xf32>
    %6 = vector.shape_cast %5 : vector<1x1x128xf32> to vector<1x128xf32>
    %c0_6 = arith.constant 0 : index
    %c0_7 = arith.constant 0 : index
    %c0_8 = arith.constant 0 : index
    %7 = vector.load %arg5[%c0_6, %c0_7, %c0_8] : memref<1x1x128xf32, #tpu.memory_space<vmem>>, vector<1x1x128xf32>
    %8 = vector.shape_cast %7 : vector<1x1x128xf32> to vector<1x128xf32>
    %cst = arith.constant dense<0.000000e+00> : vector<8xf32>
    %9 = vector.multi_reduction <add>, %4, %cst [1] : vector<8x128xf32> to vector<8xf32>
    %10 = vector.shape_cast %9 : vector<8xf32> to vector<8x1xf32>
    %cst_9 = arith.constant 1.280000e+02 : f32
    %11 = vector.broadcast %cst_9 : f32 to vector<8x1xf32>
    %12 = arith.divf %10, %11 : vector<8x1xf32>
    %13 = arith.mulf %4, %4 : vector<8x128xf32>
    %cst_10 = arith.constant dense<0.000000e+00> : vector<8xf32>
    %14 = vector.multi_reduction <add>, %13, %cst_10 [1] : vector<8x128xf32> to vector<8xf32>
    %15 = vector.shape_cast %14 : vector<8xf32> to vector<8x1xf32>
    %cst_11 = arith.constant 1.280000e+02 : f32
    %16 = vector.broadcast %cst_11 : f32 to vector<8x1xf32>
    %17 = arith.divf %15, %16 : vector<8x1xf32>
    %18 = arith.mulf %12, %12 : vector<8x1xf32>
    %19 = arith.subf %17, %18 : vector<8x1xf32>
    %20 = vector.broadcast %12 : vector<8x1xf32> to vector<8x128xf32>
    %21 = arith.subf %4, %20 : vector<8x128xf32>
    %cst_12 = arith.constant 9.99999974E-6 : f32
    %22 = vector.broadcast %cst_12 : f32 to vector<8x1xf32>
    %23 = arith.addf %19, %22 : vector<8x1xf32>
    %24 = math.rsqrt %23 : vector<8x1xf32>
    %25 = vector.broadcast %24 : vector<8x1xf32> to vector<8x128xf32>
    %26 = arith.mulf %21, %25 : vector<8x128xf32>
    %27 = vector.broadcast %6 : vector<1x128xf32> to vector<8x128xf32>
    %28 = arith.mulf %26, %27 : vector<8x128xf32>
    %29 = vector.broadcast %8 : vector<1x128xf32> to vector<8x128xf32>
    %30 = arith.addf %28, %29 : vector<8x128xf32>
    %31 = arith.truncf %30 : vector<8x128xf32> to vector<8x128xbf16>
    %c0_13 = arith.constant 0 : index
    %c0_14 = arith.constant 0 : index
    %c0_15 = arith.constant 0 : index
    %32 = vector.load %arg6[%c0_13, %c0_14, %c0_15] : memref<1x128x128xbf16, #tpu.memory_space<vmem>>, vector<1x128x128xbf16>
    %33 = vector.shape_cast %32 : vector<1x128x128xbf16> to vector<128x128xbf16>
    %cst_16 = arith.constant dense<0.000000e+00> : vector<8x128xf32>
    %34 = tpu.matmul %31, %33, %cst_16 {dimension_numbers = #tpu.dot_dimension_numbers<[1], [0], [0], [1], [0, 0, 1, 1], [], []>} : vector<8x128xbf16>, vector<128x128xbf16>, vector<8x128xf32> -> vector<8x128xf32>
    %c0_17 = arith.constant 0 : index
    %c0_18 = arith.constant 0 : index
    %c0_19 = arith.constant 0 : index
    %35 = vector.load %arg7[%c0_17, %c0_18, %c0_19] : memref<1x1x128xf32, #tpu.memory_space<vmem>>, vector<1x1x128xf32>
    %36 = vector.shape_cast %35 : vector<1x1x128xf32> to vector<1x128xf32>
    %37 = vector.broadcast %36 : vector<1x128xf32> to vector<8x128xf32>
    %38 = arith.addf %34, %37 : vector<8x128xf32>
    %c0_20 = arith.constant 0 : index
    %c0_21 = arith.constant 0 : index
    %c0_22 = arith.constant 0 : index
    %39 = vector.load %arg8[%c0_20, %c0_21, %c0_22] : memref<1x128x128xbf16, #tpu.memory_space<vmem>>, vector<1x128x128xbf16>
    %40 = vector.shape_cast %39 : vector<1x128x128xbf16> to vector<128x128xbf16>
    %cst_23 = arith.constant dense<0.000000e+00> : vector<8x128xf32>
    %41 = tpu.matmul %31, %40, %cst_23 {dimension_numbers = #tpu.dot_dimension_numbers<[1], [0], [0], [1], [0, 0, 1, 1], [], []>} : vector<8x128xbf16>, vector<128x128xbf16>, vector<8x128xf32> -> vector<8x128xf32>
    %c0_24 = arith.constant 0 : index
    %c0_25 = arith.constant 0 : index
    %c0_26 = arith.constant 0 : index
    %42 = vector.load %arg9[%c0_24, %c0_25, %c0_26] : memref<1x1x128xf32, #tpu.memory_space<vmem>>, vector<1x1x128xf32>
    %43 = vector.shape_cast %42 : vector<1x1x128xf32> to vector<1x128xf32>
    %44 = vector.broadcast %43 : vector<1x128xf32> to vector<8x128xf32>
    %45 = arith.addf %41, %44 : vector<8x128xf32>
    %c0_27 = arith.constant 0 : index
    %c0_28 = arith.constant 0 : index
    %c0_29 = arith.constant 0 : index
    %46 = vector.load %arg10[%c0_27, %c0_28, %c0_29] : memref<1x128x128xbf16, #tpu.memory_space<vmem>>, vector<1x128x128xbf16>
    %47 = vector.shape_cast %46 : vector<1x128x128xbf16> to vector<128x128xbf16>
    %cst_30 = arith.constant dense<0.000000e+00> : vector<8x128xf32>
    %48 = tpu.matmul %31, %47, %cst_30 {dimension_numbers = #tpu.dot_dimension_numbers<[1], [0], [0], [1], [0, 0, 1, 1], [], []>} : vector<8x128xbf16>, vector<128x128xbf16>, vector<8x128xf32> -> vector<8x128xf32>
    %c0_31 = arith.constant 0 : index
    %c0_32 = arith.constant 0 : index
    %c0_33 = arith.constant 0 : index
    %49 = vector.load %arg11[%c0_31, %c0_32, %c0_33] : memref<1x1x128xf32, #tpu.memory_space<vmem>>, vector<1x1x128xf32>
    %50 = vector.shape_cast %49 : vector<1x1x128xf32> to vector<1x128xf32>
    %51 = vector.broadcast %50 : vector<1x128xf32> to vector<8x128xf32>
    %52 = arith.addf %48, %51 : vector<8x128xf32>
    %cst_34 = arith.constant 0.176776692 : f32
    %53 = vector.broadcast %cst_34 : f32 to vector<8x128xf32>
    %54 = arith.mulf %38, %53 : vector<8x128xf32>
    %55 = arith.truncf %54 : vector<8x128xf32> to vector<8x128xbf16>
    %56 = vector.shape_cast %55 : vector<8x128xbf16> to vector<8x4x32xbf16>
    %57 = tpu.transpose %56, [1, 0, 2] : vector<8x4x32xbf16> -> vector<4x8x32xbf16>
    %58 = arith.truncf %45 : vector<8x128xf32> to vector<8x128xbf16>
    %59 = vector.shape_cast %58 : vector<8x128xbf16> to vector<8x4x32xbf16>
    %60 = tpu.transpose %59, [1, 0, 2] : vector<8x4x32xbf16> -> vector<4x8x32xbf16>
    %61 = arith.truncf %52 : vector<8x128xf32> to vector<8x128xbf16>
    %62 = vector.shape_cast %61 : vector<8x128xbf16> to vector<8x4x32xbf16>
    %63 = tpu.transpose %62, [1, 0, 2] : vector<8x4x32xbf16> -> vector<4x8x32xbf16>
    "tpu.trace_start"() <{level = 10 : i32, message = "hqd,hkd->hqk"}> : () -> ()
    %cst_35 = arith.constant dense<0.000000e+00> : vector<4x8x8xf32>
    %64 = tpu.matmul %57, %60, %cst_35 {dimension_numbers = #tpu.dot_dimension_numbers<[2], [2], [1], [1], [0, 0, 0, 1, 1, 1], [0], [0]>} : vector<4x8x32xbf16>, vector<4x8x32xbf16>, vector<4x8x8xf32> -> vector<4x8x8xf32>
    "tpu.trace_stop"() : () -> ()
    %c0_36 = arith.constant 0 : index
    %c0_37 = arith.constant 0 : index
    %65 = vector.load %arg2[%c0_36, %c0_37] : memref<8x8xf32, #tpu.memory_space<vmem>>, vector<8x8xf32>
    %66 = vector.shape_cast %65 : vector<8x8xf32> to vector<1x8x8xf32>
    %67 = vector.broadcast %66 : vector<1x8x8xf32> to vector<4x8x8xf32>
    %68 = arith.addf %64, %67 : vector<4x8x8xf32>
    %cst_38 = arith.constant dense<0xFF800000> : vector<4x8xf32>
    %69 = vector.multi_reduction <maximumf>, %68, %cst_38 [2] : vector<4x8x8xf32> to vector<4x8xf32>
    %70 = vector.shape_cast %69 : vector<4x8xf32> to vector<4x8x1xf32>
    %71 = vector.broadcast %70 : vector<4x8x1xf32> to vector<4x8x8xf32>
    %72 = arith.subf %68, %71 : vector<4x8x8xf32>
    %73 = math.exp %72 : vector<4x8x8xf32>
    %cst_39 = arith.constant dense<0.000000e+00> : vector<4x8xf32>
    %74 = vector.multi_reduction <add>, %73, %cst_39 [2] : vector<4x8x8xf32> to vector<4x8xf32>
    %75 = vector.shape_cast %74 : vector<4x8xf32> to vector<4x8x1xf32>
    %76 = tpu.reciprocal %75 {approx = true} : vector<4x8x1xf32> -> vector<4x8x1xf32>
    %77 = vector.broadcast %76 : vector<4x8x1xf32> to vector<4x8x8xf32>
    %78 = arith.mulf %73, %77 : vector<4x8x8xf32>
    %79 = arith.truncf %78 : vector<4x8x8xf32> to vector<4x8x8xbf16>
    "tpu.trace_start"() <{level = 10 : i32, message = "hqk,hkd->hqd"}> : () -> ()
    %cst_40 = arith.constant dense<0.000000e+00> : vector<4x8x32xf32>
    %80 = tpu.matmul %79, %63, %cst_40 {dimension_numbers = #tpu.dot_dimension_numbers<[2], [1], [1], [2], [0, 0, 0, 1, 1, 2], [0], [0]>} : vector<4x8x8xbf16>, vector<4x8x32xbf16>, vector<4x8x32xf32> -> vector<4x8x32xf32>
    "tpu.trace_stop"() : () -> ()
    %81 = arith.truncf %80 : vector<4x8x32xf32> to vector<4x8x32xbf16>
    %82 = tpu.transpose %81, [1, 0, 2] : vector<4x8x32xbf16> -> vector<8x4x32xbf16>
    %83 = vector.shape_cast %82 : vector<8x4x32xbf16> to vector<8x128xbf16>
    %c0_41 = arith.constant 0 : index
    %c0_42 = arith.constant 0 : index
    %c0_43 = arith.constant 0 : index
    %84 = vector.load %arg12[%c0_41, %c0_42, %c0_43] : memref<1x128x128xbf16, #tpu.memory_space<vmem>>, vector<1x128x128xbf16>
    %85 = vector.shape_cast %84 : vector<1x128x128xbf16> to vector<128x128xbf16>
    %cst_44 = arith.constant dense<0.000000e+00> : vector<8x128xf32>
    %86 = tpu.matmul %83, %85, %cst_44 {dimension_numbers = #tpu.dot_dimension_numbers<[1], [0], [0], [1], [0, 0, 1, 1], [], []>} : vector<8x128xbf16>, vector<128x128xbf16>, vector<8x128xf32> -> vector<8x128xf32>
    %c0_45 = arith.constant 0 : index
    %c0_46 = arith.constant 0 : index
    %c0_47 = arith.constant 0 : index
    %87 = vector.load %arg13[%c0_45, %c0_46, %c0_47] : memref<1x1x128xf32, #tpu.memory_space<vmem>>, vector<1x1x128xf32>
    %88 = vector.shape_cast %87 : vector<1x1x128xf32> to vector<1x128xf32>
    %89 = vector.broadcast %88 : vector<1x128xf32> to vector<8x128xf32>
    %90 = arith.addf %86, %89 : vector<8x128xf32>
    %91 = arith.addf %4, %90 : vector<8x128xf32>
    %c0_48 = arith.constant 0 : index
    %c0_49 = arith.constant 0 : index
    %c0_50 = arith.constant 0 : index
    %92 = vector.load %arg14[%c0_48, %c0_49, %c0_50] : memref<1x1x128xf32, #tpu.memory_space<vmem>>, vector<1x1x128xf32>
    %93 = vector.shape_cast %92 : vector<1x1x128xf32> to vector<1x128xf32>
    %c0_51 = arith.constant 0 : index
    %c0_52 = arith.constant 0 : index
    %c0_53 = arith.constant 0 : index
    %94 = vector.load %arg15[%c0_51, %c0_52, %c0_53] : memref<1x1x128xf32, #tpu.memory_space<vmem>>, vector<1x1x128xf32>
    %95 = vector.shape_cast %94 : vector<1x1x128xf32> to vector<1x128xf32>
    %cst_54 = arith.constant dense<0.000000e+00> : vector<8xf32>
    %96 = vector.multi_reduction <add>, %91, %cst_54 [1] : vector<8x128xf32> to vector<8xf32>
    %97 = vector.shape_cast %96 : vector<8xf32> to vector<8x1xf32>
    %cst_55 = arith.constant 1.280000e+02 : f32
    %98 = vector.broadcast %cst_55 : f32 to vector<8x1xf32>
    %99 = arith.divf %97, %98 : vector<8x1xf32>
    %100 = arith.mulf %91, %91 : vector<8x128xf32>
    %cst_56 = arith.constant dense<0.000000e+00> : vector<8xf32>
    %101 = vector.multi_reduction <add>, %100, %cst_56 [1] : vector<8x128xf32> to vector<8xf32>
    %102 = vector.shape_cast %101 : vector<8xf32> to vector<8x1xf32>
    %cst_57 = arith.constant 1.280000e+02 : f32
    %103 = vector.broadcast %cst_57 : f32 to vector<8x1xf32>
    %104 = arith.divf %102, %103 : vector<8x1xf32>
    %105 = arith.mulf %99, %99 : vector<8x1xf32>
    %106 = arith.subf %104, %105 : vector<8x1xf32>
    %107 = vector.broadcast %99 : vector<8x1xf32> to vector<8x128xf32>
    %108 = arith.subf %91, %107 : vector<8x128xf32>
    %cst_58 = arith.constant 9.99999974E-6 : f32
    %109 = vector.broadcast %cst_58 : f32 to vector<8x1xf32>
    %110 = arith.addf %106, %109 : vector<8x1xf32>
    %111 = math.rsqrt %110 : vector<8x1xf32>
    %112 = vector.broadcast %111 : vector<8x1xf32> to vector<8x128xf32>
    %113 = arith.mulf %108, %112 : vector<8x128xf32>
    %114 = vector.broadcast %93 : vector<1x128xf32> to vector<8x128xf32>
    %115 = arith.mulf %113, %114 : vector<8x128xf32>
    %116 = vector.broadcast %95 : vector<1x128xf32> to vector<8x128xf32>
    %117 = arith.addf %115, %116 : vector<8x128xf32>
    %118 = arith.truncf %117 : vector<8x128xf32> to vector<8x128xbf16>
    %c0_59 = arith.constant 0 : index
    %c0_60 = arith.constant 0 : index
    %c0_61 = arith.constant 0 : index
    %119 = vector.load %arg16[%c0_59, %c0_60, %c0_61] : memref<1x128x512xbf16, #tpu.memory_space<vmem>>, vector<1x128x512xbf16>
    %120 = vector.shape_cast %119 : vector<1x128x512xbf16> to vector<128x512xbf16>
    %cst_62 = arith.constant dense<0.000000e+00> : vector<8x512xf32>
    %121 = tpu.matmul %118, %120, %cst_62 {dimension_numbers = #tpu.dot_dimension_numbers<[1], [0], [0], [1], [0, 0, 1, 1], [], []>} : vector<8x128xbf16>, vector<128x512xbf16>, vector<8x512xf32> -> vector<8x512xf32>
    %c0_63 = arith.constant 0 : index
    %c0_64 = arith.constant 0 : index
    %c0_65 = arith.constant 0 : index
    %122 = vector.load %arg17[%c0_63, %c0_64, %c0_65] : memref<1x1x512xf32, #tpu.memory_space<vmem>>, vector<1x1x512xf32>
    %123 = vector.shape_cast %122 : vector<1x1x512xf32> to vector<1x512xf32>
    %124 = vector.broadcast %123 : vector<1x512xf32> to vector<8x512xf32>
    %125 = arith.addf %121, %124 : vector<8x512xf32>
    %cst_66 = arith.constant 1.702000e+00 : f32
    %126 = vector.broadcast %cst_66 : f32 to vector<8x512xf32>
    %127 = arith.mulf %126, %125 : vector<8x512xf32>
    %128 = arith.negf %127 : vector<8x512xf32>
    %129 = math.exp %128 : vector<8x512xf32>
    %cst_67 = arith.constant 1.000000e+00 : f32
    %130 = vector.broadcast %cst_67 : f32 to vector<8x512xf32>
    %131 = arith.addf %130, %129 : vector<8x512xf32>
    %132 = arith.divf %130, %131 : vector<8x512xf32>
    %133 = arith.mulf %125, %132 : vector<8x512xf32>
    %134 = arith.truncf %133 : vector<8x512xf32> to vector<8x512xbf16>
    %c0_68 = arith.constant 0 : index
    %c0_69 = arith.constant 0 : index
    %c0_70 = arith.constant 0 : index
    %135 = vector.load %arg18[%c0_68, %c0_69, %c0_70] : memref<1x512x128xbf16, #tpu.memory_space<vmem>>, vector<1x512x128xbf16>
    %136 = vector.shape_cast %135 : vector<1x512x128xbf16> to vector<512x128xbf16>
    %cst_71 = arith.constant dense<0.000000e+00> : vector<8x128xf32>
    %137 = tpu.matmul %134, %136, %cst_71 {dimension_numbers = #tpu.dot_dimension_numbers<[1], [0], [0], [1], [0, 0, 1, 1], [], []>} : vector<8x512xbf16>, vector<512x128xbf16>, vector<8x128xf32> -> vector<8x128xf32>
    %c0_72 = arith.constant 0 : index
    %c0_73 = arith.constant 0 : index
    %c0_74 = arith.constant 0 : index
    %138 = vector.load %arg19[%c0_72, %c0_73, %c0_74] : memref<1x1x128xf32, #tpu.memory_space<vmem>>, vector<1x1x128xf32>
    %139 = vector.shape_cast %138 : vector<1x1x128xf32> to vector<1x128xf32>
    %140 = vector.broadcast %139 : vector<1x128xf32> to vector<8x128xf32>
    %141 = arith.addf %137, %140 : vector<8x128xf32>
    %142 = arith.addf %91, %141 : vector<8x128xf32>
    %c0_75 = arith.constant 0 : index
    %c0_76 = arith.constant 0 : index
    %c0_77 = arith.constant 0 : index
    %143 = vector.load %arg23[%c0_75, %c0_76, %c0_77] : memref<1x8x128xf32, #tpu.memory_space<vmem>>, vector<1x8x128xf32>
    %144 = vector.shape_cast %143 : vector<1x8x128xf32> to vector<8x128xf32>
    %145 = vector.shape_cast %142 : vector<8x128xf32> to vector<1x8x128xf32>
    tpu.vector_store %arg23[%c0_75, %c0_76, %c0_77], %145 {strides = array<i32>} : memref<1x8x128xf32, #tpu.memory_space<vmem>>, vector<1x8x128xf32>,
    %c1_i32 = arith.constant 1 : i32
    %146 = arith.cmpi eq, %arg1, %c1_i32 : i32
    %147 = arith.extui %146 : i1 to i32
    %c0_i32_78 = arith.constant 0 : i32
    %148 = arith.cmpi ne, %147, %c0_i32_78 : i32
    scf.if %148 {
      %c0_79 = arith.constant 0 : index
      %c0_80 = arith.constant 0 : index
      %149 = vector.load %arg20[%c0_79, %c0_80] : memref<1x128xf32, #tpu.memory_space<vmem>>, vector<1x128xf32>
      %c0_81 = arith.constant 0 : index
      %c0_82 = arith.constant 0 : index
      %150 = vector.load %arg21[%c0_81, %c0_82] : memref<1x128xf32, #tpu.memory_space<vmem>>, vector<1x128xf32>
      %cst_83 = arith.constant dense<0.000000e+00> : vector<8xf32>
      %151 = vector.multi_reduction <add>, %142, %cst_83 [1] : vector<8x128xf32> to vector<8xf32>
      %152 = vector.shape_cast %151 : vector<8xf32> to vector<8x1xf32>
      %cst_84 = arith.constant 1.280000e+02 : f32
      %153 = vector.broadcast %cst_84 : f32 to vector<8x1xf32>
      %154 = arith.divf %152, %153 : vector<8x1xf32>
      %155 = arith.mulf %142, %142 : vector<8x128xf32>
      %cst_85 = arith.constant dense<0.000000e+00> : vector<8xf32>
      %156 = vector.multi_reduction <add>, %155, %cst_85 [1] : vector<8x128xf32> to vector<8xf32>
      %157 = vector.shape_cast %156 : vector<8xf32> to vector<8x1xf32>
      %cst_86 = arith.constant 1.280000e+02 : f32
      %158 = vector.broadcast %cst_86 : f32 to vector<8x1xf32>
      %159 = arith.divf %157, %158 : vector<8x1xf32>
      %160 = arith.mulf %154, %154 : vector<8x1xf32>
      %161 = arith.subf %159, %160 : vector<8x1xf32>
      %162 = vector.broadcast %154 : vector<8x1xf32> to vector<8x128xf32>
      %163 = arith.subf %142, %162 : vector<8x128xf32>
      %cst_87 = arith.constant 9.99999974E-6 : f32
      %164 = vector.broadcast %cst_87 : f32 to vector<8x1xf32>
      %165 = arith.addf %161, %164 : vector<8x1xf32>
      %166 = math.rsqrt %165 : vector<8x1xf32>
      %167 = vector.broadcast %166 : vector<8x1xf32> to vector<8x128xf32>
      %168 = arith.mulf %163, %167 : vector<8x128xf32>
      %169 = vector.broadcast %149 : vector<1x128xf32> to vector<8x128xf32>
      %170 = arith.mulf %168, %169 : vector<8x128xf32>
      %171 = vector.broadcast %150 : vector<1x128xf32> to vector<8x128xf32>
      %172 = arith.addf %170, %171 : vector<8x128xf32>
      %c0_88 = arith.constant 0 : index
      %c0_89 = arith.constant 0 : index
      %c0_90 = arith.constant 0 : index
      %173 = vector.load %arg22[%c0_88, %c0_89, %c0_90] : memref<1x8x128xf32, #tpu.memory_space<vmem>>, vector<1x8x128xf32>
      %174 = vector.shape_cast %173 : vector<1x8x128xf32> to vector<8x128xf32>
      %175 = vector.shape_cast %172 : vector<8x128xf32> to vector<1x8x128xf32>
      tpu.vector_store %arg22[%c0_88, %c0_89, %c0_90], %175 {strides = array<i32>} : memref<1x8x128xf32, #tpu.memory_space<vmem>>, vector<1x8x128xf32>,
    } else {
    }
    return
  }
  func.func @transform_0(%arg0: i32, %arg1: i32) -> (i32, i32) {
    %c0_i32 = arith.constant 0 : i32
    %c0_i32_0 = arith.constant 0 : i32
    %c0_i32_1 = arith.constant 0 : i32
    return %c0_i32, %c0_i32_0 : i32, i32
  }
  func.func @transform_1(%arg0: i32, %arg1: i32) -> (i32, i32, i32) {
    %c0_i32 = arith.constant 0 : i32
    %c0_i32_0 = arith.constant 0 : i32
    %c0_i32_1 = arith.constant 0 : i32
    return %arg0, %c0_i32, %c0_i32_0 : i32, i32, i32
  }
  func.func @transform_2(%arg0: i32, %arg1: i32) -> (i32, i32, i32) {
    %c0_i32 = arith.constant 0 : i32
    %c0_i32_0 = arith.constant 0 : i32
    %c0_i32_1 = arith.constant 0 : i32
    return %arg1, %c0_i32, %c0_i32_0 : i32, i32, i32
  }
  func.func @transform_3(%arg0: i32, %arg1: i32) -> (i32, i32, i32) {
    %c0_i32 = arith.constant 0 : i32
    %c0_i32_0 = arith.constant 0 : i32
    %c0_i32_1 = arith.constant 0 : i32
    return %arg1, %c0_i32, %c0_i32_0 : i32, i32, i32
  }
  func.func @transform_4(%arg0: i32, %arg1: i32) -> (i32, i32, i32) {
    %c0_i32 = arith.constant 0 : i32
    %c0_i32_0 = arith.constant 0 : i32
    %c0_i32_1 = arith.constant 0 : i32
    return %arg1, %c0_i32, %c0_i32_0 : i32, i32, i32
  }
  func.func @transform_5(%arg0: i32, %arg1: i32) -> (i32, i32, i32) {
    %c0_i32 = arith.constant 0 : i32
    %c0_i32_0 = arith.constant 0 : i32
    %c0_i32_1 = arith.constant 0 : i32
    return %arg1, %c0_i32, %c0_i32_0 : i32, i32, i32
  }
  func.func @transform_6(%arg0: i32, %arg1: i32) -> (i32, i32, i32) {
    %c0_i32 = arith.constant 0 : i32
    %c0_i32_0 = arith.constant 0 : i32
    %c0_i32_1 = arith.constant 0 : i32
    return %arg1, %c0_i32, %c0_i32_0 : i32, i32, i32
  }
  func.func @transform_7(%arg0: i32, %arg1: i32) -> (i32, i32, i32) {
    %c0_i32 = arith.constant 0 : i32
    %c0_i32_0 = arith.constant 0 : i32
    %c0_i32_1 = arith.constant 0 : i32
    return %arg1, %c0_i32, %c0_i32_0 : i32, i32, i32
  }
  func.func @transform_8(%arg0: i32, %arg1: i32) -> (i32, i32, i32) {
    %c0_i32 = arith.constant 0 : i32
    %c0_i32_0 = arith.constant 0 : i32
    %c0_i32_1 = arith.constant 0 : i32
    return %arg1, %c0_i32, %c0_i32_0 : i32, i32, i32
  }
  func.func @transform_9(%arg0: i32, %arg1: i32) -> (i32, i32, i32) {
    %c0_i32 = arith.constant 0 : i32
    %c0_i32_0 = arith.constant 0 : i32
    %c0_i32_1 = arith.constant 0 : i32
    return %arg1, %c0_i32, %c0_i32_0 : i32, i32, i32
  }
  func.func @transform_10(%arg0: i32, %arg1: i32) -> (i32, i32, i32) {
    %c0_i32 = arith.constant 0 : i32
    %c0_i32_0 = arith.constant 0 : i32
    %c0_i32_1 = arith.constant 0 : i32
    return %arg1, %c0_i32, %c0_i32_0 : i32, i32, i32
  }
  func.func @transform_11(%arg0: i32, %arg1: i32) -> (i32, i32, i32) {
    %c0_i32 = arith.constant 0 : i32
    %c0_i32_0 = arith.constant 0 : i32
    %c0_i32_1 = arith.constant 0 : i32
    return %arg1, %c0_i32, %c0_i32_0 : i32, i32, i32
  }
  func.func @transform_12(%arg0: i32, %arg1: i32) -> (i32, i32, i32) {
    %c0_i32 = arith.constant 0 : i32
    %c0_i32_0 = arith.constant 0 : i32
    %c0_i32_1 = arith.constant 0 : i32
    return %arg1, %c0_i32, %c0_i32_0 : i32, i32, i32
  }
  func.func @transform_13(%arg0: i32, %arg1: i32) -> (i32, i32, i32) {
    %c0_i32 = arith.constant 0 : i32
    %c0_i32_0 = arith.constant 0 : i32
    %c0_i32_1 = arith.constant 0 : i32
    return %arg1, %c0_i32, %c0_i32_0 : i32, i32, i32
  }
  func.func @transform_14(%arg0: i32, %arg1: i32) -> (i32, i32, i32) {
    %c0_i32 = arith.constant 0 : i32
    %c0_i32_0 = arith.constant 0 : i32
    %c0_i32_1 = arith.constant 0 : i32
    return %arg1, %c0_i32, %c0_i32_0 : i32, i32, i32
  }
  func.func @transform_15(%arg0: i32, %arg1: i32) -> (i32, i32, i32) {
    %c0_i32 = arith.constant 0 : i32
    %c0_i32_0 = arith.constant 0 : i32
    %c0_i32_1 = arith.constant 0 : i32
    return %arg1, %c0_i32, %c0_i32_0 : i32, i32, i32
  }
  func.func @transform_16(%arg0: i32, %arg1: i32) -> (i32, i32, i32) {
    %c0_i32 = arith.constant 0 : i32
    %c0_i32_0 = arith.constant 0 : i32
    %c0_i32_1 = arith.constant 0 : i32
    return %arg1, %c0_i32, %c0_i32_0 : i32, i32, i32
  }
  func.func @transform_17(%arg0: i32, %arg1: i32) -> (i32, i32, i32) {
    %c0_i32 = arith.constant 0 : i32
    %c0_i32_0 = arith.constant 0 : i32
    %c0_i32_1 = arith.constant 0 : i32
    return %arg1, %c0_i32, %c0_i32_0 : i32, i32, i32
  }
  func.func @transform_18(%arg0: i32, %arg1: i32) -> (i32, i32) {
    %c0_i32 = arith.constant 0 : i32
    %c0_i32_0 = arith.constant 0 : i32
    %c0_i32_1 = arith.constant 0 : i32
    return %c0_i32, %c0_i32_0 : i32, i32
  }
  func.func @transform_19(%arg0: i32, %arg1: i32) -> (i32, i32) {
    %c0_i32 = arith.constant 0 : i32
    %c0_i32_0 = arith.constant 0 : i32
    %c0_i32_1 = arith.constant 0 : i32
    return %c0_i32, %c0_i32_0 : i32, i32
  }
  func.func @transform_20(%arg0: i32, %arg1: i32) -> (i32, i32, i32) {
    %c0_i32 = arith.constant 0 : i32
    %c0_i32_0 = arith.constant 0 : i32
    %c0_i32_1 = arith.constant 0 : i32
    return %arg0, %c0_i32, %c0_i32_0 : i32, i32, i32
  }
}

</mosaic_0001>

<bundles_post_ra>
// kernel: tpu_custom_call.1
= control target key start
LH: loop header
LB: loop body
LE: loop exit
PB: predicated region body
PF: predicated region fallthrough
CT: control target
= control target key end

     0   :  { %s5891_s0 = inlined_call_operand.hbm [shape: f32[8,8], index: 0, kind: input, shape index: {}]   ;;  %s5892_s1 = inlined_call_operand.hbm [shape: f32[2,8,128], index: 1, kind: input, shape index: {}]   ;;  %s5893_s2 = inlined_call_operand.vmem [shape: f32[2,1,128], index: 2, kind: input, shape index: {}]   ;;  %s5894_s3 = inlined_call_operand.vmem [shape: f32[2,1,128], index: 3, kind: input, shape index: {}]   ;;  %s5895_s4 = inlined_call_operand.hbm [shape: bf16[2,128,128], index: 4, kind: input, shape index: {}]   ;;  %s5896_s5 = inlined_call_operand.vmem [shape: f32[2,1,128], index: 5, kind: input, shape index: {}]   ;;  %s5897_s6 = inlined_call_operand.hbm [shape: bf16[2,128,128], index: 6, kind: input, shape index: {}]   ;;  %s5898_s7 = inlined_call_operand.vmem [shape: f32[2,1,128], index: 7, kind: input, shape index: {}]   ;;  %s5899_s8 = inlined_call_operand.hbm [shape: bf16[2,128,128], index: 8, kind: input, shape index: {}]   ;;  %s5900_s9 = inlined_call_operand.vmem [shape: f32[2,1,128], index: 9, kind: input, shape index: {}]   ;;  %s5901_s10 = inlined_call_operand.hbm [shape: bf16[2,128,128], index: 10, kind: input, shape index: {}]   ;;  %s5902_s11 = inlined_call_operand.vmem [shape: f32[2,1,128], index: 11, kind: input, shape index: {}]   ;;  %s5903_s12 = inlined_call_operand.vmem [shape: f32[2,1,128], index: 12, kind: input, shape index: {}]   ;;  %s5904_s13 = inlined_call_operand.vmem [shape: f32[2,1,128], index: 13, kind: input, shape index: {}]   ;;  %s5905_s14 = inlined_call_operand.hbm [shape: bf16[2,128,512], index: 14, kind: input, shape index: {}]   ;;  %s5906_s15 = inlined_call_operand.vmem [shape: f32[2,1,512], index: 15, kind: input, shape index: {}]   ;;  %s5907_s16 = inlined_call_operand.hbm [shape: bf16[2,512,128], index: 16, kind: input, shape index: {}]   ;;  %s5908_s17 = inlined_call_operand.vmem [shape: f32[2,1,128], index: 17, kind: input, shape index: {}]   ;;  %s5909_s18 = inlined_call_operand.vmem [shape: f32[1,128], index: 18, kind: input, shape index: {}]   ;;  %s5910_s19 = inlined_call_operand.vmem [shape: f32[1,128], index: 19, kind: input, shape index: {}]   ;;  %s5911_s20 = inlined_call_operand.hbm [shape: f32[2,8,128], index: 20, kind: output, shape index: {}]  }
   0x1   :  { %5956 = sst [smem:[#allocation43_spill]] %s5891_s0 }
   0x2   :  { %5957 = sst [smem:[#allocation44_spill]] %s5892_s1 }
   0x3   :  { %5958 = sst [smem:[#allocation45_spill]] %s5893_s2 }
   0x4   :  { %5959 = sst [smem:[#allocation46_spill]] %s5894_s3 }
   0x5   :  { %5960 = sst [smem:[#allocation47_spill]] %s5895_s4 }
   0x6   :  { %5961 = sst [smem:[#allocation48_spill]] %s5896_s5 }
   0x7   :  { %5962 = sst [smem:[#allocation49_spill]] %s5897_s6 }
   0x8   :  { %5963 = sst [smem:[#allocation50_spill]] %s5898_s7 }
   0x9   :  { %5964 = sst [smem:[#allocation51_spill]] %s5899_s8 }
   0xa   :  { %5965 = sst [smem:[#allocation52_spill]] %s5900_s9 }
   0xb   :  { %5966 = sst [smem:[#allocation53_spill]] %s5901_s10 }
   0xc   :  { %5967 = sst [smem:[#allocation54_spill]] %s5902_s11 }
   0xd   :  { %5968 = sst [smem:[#allocation55_spill]] %s5903_s12 }
   0xe   :  { %5969 = sst [smem:[#allocation56_spill]] %s5904_s13 }
   0xf   :  { %5970 = sst [smem:[#allocation57_spill]] %s5905_s14 }
  0x10   :  { %5971 = sst [smem:[#allocation58_spill]] %s5906_s15 }
  0x11   :  { %5972 = sst [smem:[#allocation59_spill]] %s5907_s16 }
  0x12   :  { %5973 = sst [smem:[#allocation60_spill]] %s5908_s17 }
  0x13   :  { %5974 = sst [smem:[#allocation61_spill]] %s5909_s18 }
  0x14   :  { %5975 = sst [smem:[#allocation62_spill]] %s5910_s19 }
  0x15   :  { %5976 = sst [smem:[#allocation63_spill]] %s5911_s20 }
  0x16   :  { %25 = vsyncpa [#allocation4], 0 }
  0x17   :  { %26 = vsyncpa [#allocation7], 0 }
  0x18   :  { %28 = vsyncpa [#allocation7 + $0x1], 0 }
  0x19   :  { %29 = vsyncpa [#allocation10], 0 }
  0x1a   :  { %31 = vsyncpa [#allocation10 + $0x1], 0 }
  0x1b   :  { %32 = vsyncpa [#allocation13], 0 }
  0x1c   :  { %34 = vsyncpa [#allocation13 + $0x1], 0 }
  0x1d   :  { %35 = vsyncpa [#allocation16], 0 }
  0x1e   :  { %37 = vsyncpa [#allocation16 + $0x1], 0 }
  0x1f   :  { %38 = vsyncpa [#allocation5], 0 }
  0x20   :  { %40 = vsyncpa [#allocation5 + $0x1], 0  ;;  %s4909_s1 = smov 0   ;;  %s4911_s22 = smov 0  }
  0x21   :  { %s4913_s23 = smov 0   ;;  %s4915_s24 = smov 0  }
  0x22   :  { %s4917_s2 = smov 0   ;;  %s4919_s25 = smov 0  }
  0x23   :  { %s4921_s3 = smov 0   ;;  %s4923_s26 = smov 0  }
  0x24   :  { %s4925_s27 = smov 0   ;;  %s4927_s28 = smov 0  }
  0x25   :  { %s4929_s4 = smov 0  }
  0x26 LB: > { %5977 = sst [smem:[#allocation25_spill]] %s4745_s22  ;;  %s55_s29 = sadd.s32 1, %s4773_s27  ;;  %s4781_s4 = sphi %s4929_s4, %s46_s4   ;;  %s4777_s28 = sphi %s4927_s28, %s6083_s28   ;;  %s4773_s27 = sphi %s4925_s27, %s6082_s27   ;;  %s4769_s26 = sphi %s4923_s26, %s6081_s26   ;;  %s4765_s3 = sphi %s4921_s3, %s6080_s3   ;;  %s4761_s25 = sphi %s4919_s25, %s6079_s25   ;;  %s4757_s2 = sphi %s4917_s2, %s6078_s2   ;;  %s4753_s24 = sphi %s4915_s24, %s6077_s24   ;;  %s4749_s23 = sphi %s4913_s23, %s6076_s23   ;;  %s4745_s22 = sphi %s4911_s22, %s6075_s22   ;;  %s4741_s1 = sphi %s4909_s1, %s6074_s1  }
  0x27   : > { %5978 = sst [smem:[#allocation26_spill]] %s4749_s23  ;;  %s58_s30 = sadd.s32 1, %s4777_s28 }
  0x28   : > { %5979 = sst [smem:[#allocation27_spill]] %s4753_s24  ;;  %p56_p0 = scmp.ge.s32.totalorder %s55_s29, 2 }
  0x29   : > { %5980 = sst [smem:[#allocation28_spill]] %s4757_s2  ;;  %s86_s0 = sadd.s32 1, %s4761_s25 }
  0x2a   : > { %5981 = sst [smem:[#allocation29_spill]] %s4761_s25  ;;  %p5918_p1 = scmp.ne.s32.totalorder %s4761_s25, %s4757_s2 }
  0x2b   : > { %5982 = sst [smem:[#allocation30_spill]] %s4765_s3  ;;  %p94_p2 = scmp.eq.s32.totalorder %s4781_s4, 0 }
  0x2c   : > { %5983 = sst [smem:[#allocation31_spill]] %s4769_s26  ;;  %s6085_s29 = smov (%p56_p0, %s55_s29), 0 }
  0x2d   : > { %5984 = sst [smem:[#allocation32_spill]] %s4773_s27  ;;  %s6087_s30 = smov (!%p56_p0, %s58_s30), %s4777_s28 }
  0x2e   : > { %5985 = sst [smem:[#allocation33_spill]] %s4777_s28  ;;  %p4976_p3 = por %p94_p2, %p5918_p1 }
  0x2f   : > { %5986 = sst [smem:[#allocation34_spill]] %s4781_s4  ;;  %s161_s20 = ssub.s32 %s4773_s27, %s6085_s29 }
  0x30   : > { %5987 = sst [smem:[#allocation35_spill]] %s6085_s29  ;;  %p60_p4 = scmp.ge.s32.totalorder %s6087_s30, 2 }
  0x31   : > { %p162_p5 = scmp.eq.s32.totalorder %s161_s20, 0  ;;  %s164_s26 = sadd.s32 1, %s4749_s23 }
  0x32   : > { %p171_p6 = scmp.ne.s32.totalorder %s4749_s23, %s4745_s22  ;;  %s6089_s30 = smov (%p60_p4, %s6087_s30), 0 }
  0x33   : > { %5989 = sst [smem:[#allocation36_spill]] %s6089_s30  ;;  %s83_s18 = ssub.s32 %s4777_s28, %s6089_s30 }
  0x34   : > { %s4988_s19 = scalar_select %p162_p5, %s4749_s23, %s164_s26  }
  0x35   : > { %p4992_p7 = por %p171_p6, %p94_p2  ;;  %p84_p8 = scmp.eq.s32.totalorder %s83_s18, 0 }
  0x36   : > { %5990 = sst [smem:[#allocation37_spill]] %s4988_s19  ;;  %p4146_p9 = scmp.lt.s32.totalorder %s4781_s4, 4 }
  0x37   : > { %s4998_s17 = sand.u32 1, %s4781_s4   ;;  %s626_s29 = sand.u32 1, %s4761_s25  }
  0x38   : > { %s5001_s20 = scalar_select %p84_p8, %s4761_s25, %s86_s0  }
  0x39   : > { %s3709_s13 = sshll.u32 %s626_s29, 3  ;;  %s3710_s12 = sshll.u32 %s4777_s28, 7 }
  0x3a   : > { %5992 = sst [smem:[#allocation38_spill]] %s5001_s20  ;;  %s5993_s26 = sld [smem:[#allocation44_spill]] }
  0x3b   : > { %s628_s30 = scalar_lea.vmem [#allocation6], %s3709_s13  ;;  %p5012_p10 = pnand %p4146_p9, %p4976_p3 }
  0x3c   : > { %s635_s18 = sshll.u32 %s628_s30, 4  ;;  %p5020_p11 = pnand %p4146_p9, %p4992_p7  ;;  %s5016_s18 = int_to_ptr.vmem [resolvable:$true] %s635_s18 }
  0x3d   : > { %s5919_s11 = scalar_lea.sflag [#allocation7], %s4998_s17  ;;  %p4403_p13 = pneg %p5012_p10 }
  0x3e   : > { %s5996_s9 = scalar_select %p5020_p11, 1, 0 }
  0x40   : > { %s5994_s7 = smov %s5993_s26  ;;  %s5008_s19 = scalar_lea.hbm %s5993_s26, %s3710_s12 }
  0x41   : > { %s4401_s12 = scalar_lea.hbm %s5008_s19, 128  ;;  %s4406_s30 = scalar_lea.hbm %s5994_s7, 256 }
  0x42   : > { %p4402_p12 = scmp.ne.s32.totalorder %s5008_s19, %s4401_s12  ;;  %p4407_p3 = scmp.lt.u32.totalorder %s5008_s19, %s5994_s7 }
  0x43   : > { %p4408_p4 = scmp.lt.u32.totalorder %s4406_s30, %s4401_s12  ;;  %p4410_p6 = scmp.lt.u32.totalorder %s4401_s12, %s5008_s19 }
  0x44   : > { %p4404_p0 = pnand %p4403_p13, %p4402_p12 }
  0x45   : > { %p4409_p5 = por %p4408_p4, %p4407_p3 }
  0x46   : > { %p4405_p2 = pneg %p4404_p0 }
  0x47   : > { %p4411_p7 = por %p4410_p6, %p4409_p5 }
  0x49   : > { %p4412_p8 = pnand %p4411_p7, %p4405_p2 }
  0x4b   : > { %4415 = shalt.err (!%p4412_p8)
}
  0x4c   : > { %s4416_s15 = scalar_lea.vmem %s5016_s18, 128  ;;  %s4783_s26 = smov [#allocation6]  }
  0x4d   : > { %p4417_p9 = scmp.ne.s32.totalorder %s5016_s18, %s4416_s15  ;;  %s4421_s13 = sshll.u32 %s4783_s26, 4  ;;  %s4422_s13 = int_to_ptr.vmem [resolvable:$false] %s4421_s13 }
  0x4e   : > { %s4423_s29 = scalar_lea.vmem %s4422_s13, 256  ;;  %p4424_p1 = scmp.lt.s32.totalorder %s5016_s18, %s4422_s13 }
  0x4f   : > { %p4419_p12 = pnand %p4417_p9, %p4403_p13  ;;  %p4425_p3 = scmp.lt.s32.totalorder %s4423_s29, %s4416_s15 }
  0x51   : > { %p4420_p0 = pneg %p4419_p12  ;;  %p4426_p4 = por %p4425_p3, %p4424_p1 }
  0x53   : > { %p4427_p5 = pnand %p4426_p4, %p4420_p0 }
  0x55   : > { %4430 = shalt.err (!%p4427_p5)
}
  0x56   : > { %4122 = dma.hbm_to_vmem [thread:$0]  (!%p5012_p10), %s5008_s19, 128, %s5016_s18, %s5919_s11  }
  0x57   : > { %s5053_s12 = sand.u32 1, %s4749_s23   ;;  %s5056_s30 = sshll.u32 %s4773_s27, 10 }
  0x58   : > { %s5059_s0 = sshll.u32 %s5053_s12, 6  ;;  %s5997_s6 = sld [smem:[#allocation49_spill]] }
  0x59   : > { %s685_s26 = scalar_lea.vmem [#allocation9], %s5059_s0  ;;  %p5075_p10 = pneg %p5020_p11 }
  0x5a   : > { %s692_s19 = sshll.u32 %s685_s26, 4  ;;  %s5068_s19 = int_to_ptr.vmem [resolvable:$true] %s692_s19 }
  0x5b   : > { %s5998_s29 = scalar_select %p5075_p10, 1, 0 }
  0x5e   : > { %s5065_s5 = scalar_lea.hbm %s5997_s6, %s5056_s30  ;;  %s4436_s11 = scalar_lea.hbm %s5997_s6, 2048 }
  0x5f   : > { %s4431_s13 = scalar_lea.hbm %s5065_s5, 1024  ;;  %p4437_p6 = scmp.lt.u32.totalorder %s5065_s5, %s5997_s6 }
  0x60   : > { %p4432_p1 = scmp.ne.s32.totalorder %s5065_s5, %s4431_s13  ;;  %p4438_p7 = scmp.lt.u32.totalorder %s4436_s11, %s4431_s13 }
  0x61   : > { %p4440_p9 = scmp.lt.u32.totalorder %s4431_s13, %s5065_s5 }
  0x62   : > { %p4434_p13 = pnand %p5075_p10, %p4432_p1  ;;  %p4439_p8 = por %p4438_p7, %p4437_p6 }
  0x64   : > { %p4435_p2 = pneg %p4434_p13  ;;  %p4441_p12 = por %p4440_p9, %p4439_p8 }
  0x66   : > { %p4442_p0 = pnand %p4441_p12, %p4435_p2 }
  0x68   : > { %4445 = shalt.err (!%p4442_p0)
}
  0x69   : > { %s4446_s18 = scalar_lea.vmem %s5068_s19, 1024  ;;  %s4784_s21 = smov [#allocation9]  }
  0x6a   : > { %p4447_p3 = scmp.ne.s32.totalorder %s5068_s19, %s4446_s18  ;;  %s4451_s15 = sshll.u32 %s4784_s21, 4  ;;  %s4452_s15 = int_to_ptr.vmem [resolvable:$false] %s4451_s15 }
  0x6b   : > { %s4453_s7 = scalar_lea.vmem %s4452_s15, 2048  ;;  %p4454_p1 = scmp.lt.s32.totalorder %s5068_s19, %s4452_s15 }
  0x6c   : > { %p4449_p4 = pnand %p4447_p3, %p5075_p10  ;;  %p4455_p13 = scmp.lt.s32.totalorder %s4453_s7, %s4446_s18 }
  0x6e   : > { %p4450_p5 = pneg %p4449_p4  ;;  %p4456_p6 = por %p4455_p13, %p4454_p1 }
  0x70   : > { %p4457_p7 = pnand %p4456_p6, %p4450_p5 }
  0x72   : > { %4460 = shalt.err (!%p4457_p7)
}
  0x73   : > { %s5925_s11 = smov 64   ;;  %s5927_s13 = smov 4  }
  0x74   : > { %s5999_s26 = scalar_lea.sflag [#allocation10], %s4998_s17  ;;  %s6000_s10 = sld [smem:[#allocation53_spill]] }
  0x75   : > { %4128 = dma.hbm_to_vmem [thread:$0]  (!%p5020_p11), %s5065_s5, 1024, %s5068_s19, %s5999_s26, %s5925_s11, %s5925_s11, %s5927_s13  }
  0x76   : > { %s739_s7 = scalar_lea.vmem [#allocation12], %s5059_s0  ;;  %s5924_s28 = scalar_lea.sflag [#allocation13], %s4998_s17 }
  0x77   : > { %s746_s6 = sshll.u32 %s739_s7, 4  ;;  %s5110_s6 = int_to_ptr.vmem [resolvable:$true] %s746_s6 }
  0x7a   : > { %s5107_s15 = scalar_lea.hbm %s6000_s10, %s5056_s30  ;;  %s4466_s26 = scalar_lea.hbm %s6000_s10, 2048 }
  0x7b   : > { %s4461_s20 = scalar_lea.hbm %s5107_s15, 1024  ;;  %p4467_p12 = scmp.lt.u32.totalorder %s5107_s15, %s6000_s10 }
  0x7c   : > { %p4462_p2 = scmp.ne.s32.totalorder %s5107_s15, %s4461_s20  ;;  %p4468_p0 = scmp.lt.u32.totalorder %s4466_s26, %s4461_s20 }
  0x7d   : > { %p4470_p4 = scmp.lt.u32.totalorder %s4461_s20, %s5107_s15 }
  0x7e   : > { %p4464_p8 = pnand %p4462_p2, %p5075_p10  ;;  %p4469_p3 = por %p4468_p0, %p4467_p12 }
  0x80   : > { %p4465_p9 = pneg %p4464_p8  ;;  %p4471_p5 = por %p4470_p4, %p4469_p3 }
  0x82   : > { %p4472_p1 = pnand %p4471_p5, %p4465_p9 }
  0x84   : > { %4475 = shalt.err (!%p4472_p1)
}
  0x85   : > { %s4476_s7 = scalar_lea.vmem %s5110_s6, 1024  ;;  %s4787_s5 = smov [#allocation12]  }
  0x86   : > { %p4477_p13 = scmp.ne.s32.totalorder %s5110_s6, %s4476_s7  ;;  %s4481_s19 = sshll.u32 %s4787_s5, 4  ;;  %s4482_s19 = int_to_ptr.vmem [resolvable:$false] %s4481_s19 }
  0x87   : > { %s4483_s18 = scalar_lea.vmem %s4482_s19, 2048  ;;  %p4484_p2 = scmp.lt.s32.totalorder %s5110_s6, %s4482_s19 }
  0x88   : > { %p4479_p6 = pnand %p4477_p13, %p5075_p10  ;;  %p4485_p8 = scmp.lt.s32.totalorder %s4483_s18, %s4476_s7 }
  0x8a   : > { %p4480_p7 = pneg %p4479_p6  ;;  %p4486_p12 = por %p4485_p8, %p4484_p2 }
  0x8c   : > { %p4487_p0 = pnand %p4486_p12, %p4480_p7 }
  0x8e   : > { %4490 = shalt.err (!%p4487_p0)
}
  0x8f   : > { %4134 = dma.hbm_to_vmem [thread:$0]  (!%p5020_p11), %s5107_s15, 1024, %s5110_s6, %s5924_s28, %s5925_s11, %s5925_s11, %s5927_s13  }
  0x90   : > { %s5140_s20 = sadd.s32 4294967295, %s4781_s4   ;;  %s3705_s26 = sadd.s32 4294967294, %s4781_s4  }
  0x91   : > { %p99_p9 = scmp.ne.s32.totalorder %s4757_s2, %s4753_s24  ;;  %p5933_p3 = scmp.eq.s32.totalorder %s5140_s20, 0 }
  0x92   : > { %p177_p4 = scmp.ne.s32.totalorder %s4745_s22, %s4741_s1  ;;  %p581_p5 = scmp.eq.s32.totalorder %s5140_s20, 3 }
  0x93   : > { %p587_p1 = scmp.eq.s32.totalorder %s3705_s26, 3  ;;  %p5151_p13 = por %p5933_p3, %p99_p9 }
  0x94   : > { %p5157_p6 = por %p177_p4, %p5933_p3  ;;  %p6005_p7 = scmp.ne.s32.totalorder %s4761_s25, %s4757_s2 }
  0x95   : > { %s6001_s21 = scalar_select %p5151_p13, 1, 0 }
  0x96   : > { %s6003_s6 = scalar_select %p5157_p6, 1, 0 }
  0x97   : > { %6002 = sst [smem:[#allocation39_spill]] %s6001_s21  ;;  %p5164_p2 = por %p581_p5, %p6005_p7 }
  0x98   : > { %6004 = sst [smem:[#allocation40_spill]] %s6003_s6  ;;  %p5168_p8 = por %p587_p1, %p99_p9 }
  0x99   : > { %s6006_s15 = scalar_select %p5164_p2, 1, 0 }
  0x9a   : > { %s6008_s1 = scalar_select %p5168_p8, 1, 0 }
  0x9b   : > { %6007 = sst [smem:[#allocation41_spill]] %s6006_s15  ;;  %p3706_p12 = scmp.ge.s32.totalorder %s4781_s4, 1 }
  0x9c   : > { %6009 = sst [smem:[#allocation42_spill]] %s6008_s1  ;;  %p594_p0 = scmp.lt.s32.totalorder %s4781_s4, 5 }
  0x9d   : > { %s4788_s5 = smov [#allocation3]   ;;  %s6011_s28 = sld [smem:[#allocation47_spill]] }
  0x9e   : > { %p5174_p11 = pnand %p3706_p12, %p594_p0  ;;  %s607_s19 = sshll.u32 %s4788_s5, 4  ;;  %s5178_s19 = int_to_ptr.vmem [resolvable:$true] %s607_s19 }
  0x9f   : > { %s658_s10 = scalar_lea.vmem [#allocation8], %s5059_s0 }
  0xa0   : > { %s6010_s7 = scalar_select %p5174_p11, 1, 0 }
  0xa1   : > { %p4115_p4 = pneg %p5174_p11  ;;  %s665_s25 = sshll.u32 %s658_s10, 4  ;;  %s5195_s25 = int_to_ptr.vmem [resolvable:$true] %s665_s25 }
  0xa3   : > { %s6012_s11 = smov %s6011_s28  ;;  %s5186_s13 = scalar_lea.hbm %s6011_s28, %s5056_s30 }
  0xa4   : > { %p5191_p9 = pnand %p4115_p4, %p5933_p3  ;;  %s4491_s5 = scalar_lea.hbm %s5186_s13, 1024 }
  0xa5   : > { %p4492_p5 = scmp.ne.s32.totalorder %s5186_s13, %s4491_s5  ;;  %s4496_s26 = scalar_lea.hbm %s6012_s11, 2048 }
  0xa6   : > { %p4497_p12 = scmp.lt.u32.totalorder %s5186_s13, %s6012_s11  ;;  %p4498_p0 = scmp.lt.u32.totalorder %s4496_s26, %s4491_s5 }
  0xa7   : > { %p4494_p1 = pnand %p4492_p5, %p5075_p10  ;;  %p4500_p3 = scmp.lt.u32.totalorder %s4491_s5, %s5186_s13 }
  0xa8   : > { %p4499_p4 = por %p4498_p0, %p4497_p12 }
  0xa9   : > { %p4495_p7 = pneg %p4494_p1 }
  0xaa   : > { %p4501_p8 = por %p4500_p3, %p4499_p4 }
  0xac   : > { %p4502_p2 = pnand %p4501_p8, %p4495_p7 }
  0xae   : > { %4505 = shalt.err (!%p4502_p2)
}
  0xaf   : > { %s4506_s10 = scalar_lea.vmem %s5195_s25, 1024  ;;  %s4789_s28 = smov [#allocation8]  }
  0xb0   : > { %p4507_p5 = scmp.ne.s32.totalorder %s5195_s25, %s4506_s10  ;;  %s4511_s18 = sshll.u32 %s4789_s28, 4  ;;  %s4512_s18 = int_to_ptr.vmem [resolvable:$false] %s4511_s18 }
  0xb1   : > { %s4513_s24 = scalar_lea.vmem %s4512_s18, 2048  ;;  %p4514_p13 = scmp.lt.s32.totalorder %s5195_s25, %s4512_s18 }
  0xb2   : > { %p4509_p1 = pnand %p4507_p5, %p5075_p10  ;;  %p4515_p11 = scmp.lt.s32.totalorder %s4513_s24, %s4506_s10 }
  0xb4   : > { %p4510_p6 = pneg %p4509_p1  ;;  %p4516_p12 = por %p4515_p11, %p4514_p13 }
  0xb6   : > { %p4517_p0 = pnand %p4516_p12, %p4510_p6 }
  0xb8   : > { %4520 = shalt.err (!%p4517_p0)
}
  0xb9   : > { %p6014_p3 = scmp.ne.s32.totalorder %s5996_s9, 0  ;;  %s6015_s1 = smov 4  }
  0xba   : > { %s6016_s5 = smov 64   ;;  %s6017_s26 = scalar_lea.sflag [#allocation7], %s4998_s17 }
  0xbb   : > { %4125 = dma.hbm_to_vmem [thread:$0]  (!%p6014_p3), %s5186_s13, 1024, %s5195_s25, %s6017_s26, %s6016_s5, %s6016_s5, %s6015_s1  }
  0xbc   : > { %s6018_s8 = sld [smem:[#allocation51_spill]]  ;;  %p4523_p13 = pneg %p5191_p9 }
  0xbd   : > { %s6019_s4 = sld [smem:[#allocation43_spill]] }
  0xc2   : > { %s5227_s18 = scalar_lea.hbm %s6018_s8, %s5056_s30 }
  0xc3   : > { %s6020_s15 = smov %s6019_s4  ;;  %s4521_s3 = scalar_lea.hbm %s6019_s4, 128 }
  0xc4   : > { %p4522_p11 = scmp.ne.s32.totalorder %s6020_s15, %s4521_s3  ;;  %p4528_p8 = scmp.lt.u32.totalorder %s4521_s3, %s6020_s15 }
  0xc6   : > { %p4524_p6 = pnand %p4523_p13, %p4522_p11 }
  0xc8   : > { %p4525_p2 = pneg %p4524_p6 }
  0xca   : > { %p4530_p7 = pnand %p4528_p8, %p4525_p2 }
  0xcc   : > { %4533 = shalt.err (!%p4530_p7)
}
  0xcd   : > { %s4534_s25 = scalar_lea.vmem %s5178_s19, 128  ;;  %p4542_p12 = scmp.lt.s32.totalorder %s5178_s19, %s5178_s19 }
  0xce   : > { %p4535_p4 = scmp.ne.s32.totalorder %s5178_s19, %s4534_s25  ;;  %p4543_p0 = scmp.lt.s32.totalorder %s4534_s25, %s4534_s25 }
  0xd0   : > { %p4537_p5 = pnand %p4535_p4, %p4523_p13  ;;  %p4544_p3 = por %p4543_p0, %p4542_p12 }
  0xd2   : > { %p4538_p1 = pneg %p4537_p5 }
  0xd4   : > { %p4545_p10 = pnand %p4544_p3, %p4538_p1 }
  0xd6   : > { %4548 = shalt.err (!%p4545_p10)
}
  0xd7   : > { %4118 = dma.hbm_to_vmem [thread:$0]  (!%p5191_p9), %s6020_s15, 128, %s5178_s19, [#allocation4]  }
  0xd8   : > { %s712_s3 = scalar_lea.vmem [#allocation11], %s5059_s0  ;;  %s3723_s30 = sshll.u32 %s5053_s12, 8 }
  0xd9   : > { %s719_s4 = sshll.u32 %s712_s3, 4  ;;  %s4549_s11 = scalar_lea.hbm %s5227_s18, 1024  ;;  %s5252_s4 = int_to_ptr.vmem [resolvable:$true] %s719_s4 }
  0xda   : > { %p4550_p10 = scmp.ne.s32.totalorder %s5227_s18, %s4549_s11  ;;  %p6021_p3 = scmp.ne.s32.totalorder %s5998_s29, 0 }
  0xdb   : > { %s4554_s21 = scalar_lea.hbm %s6018_s8, 2048  ;;  %p4555_p6 = scmp.lt.u32.totalorder %s5227_s18, %s6018_s8 }
  0xdc   : > { %p4552_p11 = pnand %p4550_p10, %p6021_p3  ;;  %p4556_p2 = scmp.lt.u32.totalorder %s4554_s21, %s4549_s11 }
  0xdd   : > { %p4558_p8 = scmp.lt.u32.totalorder %s4549_s11, %s5227_s18 }
  0xde   : > { %p4553_p13 = pneg %p4552_p11  ;;  %p4557_p9 = por %p4556_p2, %p4555_p6 }
  0xe0   : > { %p4559_p7 = por %p4558_p8, %p4557_p9 }
  0xe2   : > { %p4560_p4 = pnand %p4559_p7, %p4553_p13 }
  0xe4   : > { %4563 = shalt.err (!%p4560_p4)
}
  0xe5   : > { %s4564_s0 = scalar_lea.vmem %s5252_s4, 1024  ;;  %s4790_s19 = smov [#allocation11]  }
  0xe6   : > { %p4565_p5 = scmp.ne.s32.totalorder %s5252_s4, %s4564_s0  ;;  %s4569_s28 = sshll.u32 %s4790_s19, 4  ;;  %s4570_s28 = int_to_ptr.vmem [resolvable:$false] %s4569_s28 }
  0xe7   : > { %s4571_s10 = scalar_lea.vmem %s4570_s28, 2048  ;;  %p4572_p0 = scmp.lt.s32.totalorder %s5252_s4, %s4570_s28 }
  0xe8   : > { %p4567_p1 = pnand %p4565_p5, %p6021_p3  ;;  %p4573_p10 = scmp.lt.s32.totalorder %s4571_s10, %s4564_s0 }
  0xea   : > { %p4568_p12 = pneg %p4567_p1  ;;  %p4574_p11 = por %p4573_p10, %p4572_p0 }
  0xec   : > { %p4575_p6 = pnand %p4574_p11, %p4568_p12 }
  0xee   : > { %4578 = shalt.err (!%p4575_p6)
}
  0xef   : > { %p6022_p13 = scmp.ne.s32.totalorder %s5996_s9, 0  ;;  %s6023_s24 = scalar_lea.sflag [#allocation10], %s4998_s17 }
  0xf0   : > { %s3869_s25 = sshll.u32 %s4773_s27, 12  ;;  %s778_s22 = scalar_lea.vmem [#allocation14], %s3723_s30 }
  0xf1   : > { %4131 = dma.hbm_to_vmem [thread:$0]  (!%p6022_p13), %s5227_s18, 1024, %s5252_s4, %s6023_s24, %s6016_s5, %s6016_s5, %s6015_s1  }
  0xf2   : > { %s785_s2 = sshll.u32 %s778_s22, 4  ;;  %s6024_s14 = sld [smem:[#allocation57_spill]]  ;;  %s5290_s2 = int_to_ptr.vmem [resolvable:$true] %s785_s2 }
  0xf8   : > { %s5288_s23 = scalar_lea.hbm %s6024_s14, %s3869_s25  ;;  %s4584_s21 = scalar_lea.hbm %s6024_s14, 8192 }
  0xf9   : > { %s4579_s13 = scalar_lea.hbm %s5288_s23, 4096  ;;  %p4585_p7 = scmp.lt.u32.totalorder %s5288_s23, %s6024_s14 }
  0xfa   : > { %p4580_p2 = scmp.ne.s32.totalorder %s5288_s23, %s4579_s13  ;;  %p4586_p4 = scmp.lt.u32.totalorder %s4584_s21, %s4579_s13 }
  0xfb   : > { %p4588_p1 = scmp.lt.u32.totalorder %s4579_s13, %s5288_s23 }
  0xfc   : > { %p4582_p9 = pnand %p4580_p2, %p6021_p3  ;;  %p4587_p5 = por %p4586_p4, %p4585_p7 }
  0xfe   : > { %p4583_p8 = pneg %p4582_p9  ;;  %p4589_p12 = por %p4588_p1, %p4587_p5 }
 0x100   : > { %p4590_p0 = pnand %p4589_p12, %p4583_p8 }
 0x102   : > { %4593 = shalt.err (!%p4590_p0)
}
 0x103   : > { %s4594_s0 = scalar_lea.vmem %s5290_s2, 4096  ;;  %s4791_s19 = smov [#allocation14]  }
 0x104   : > { %p4595_p10 = scmp.ne.s32.totalorder %s5290_s2, %s4594_s0  ;;  %s4599_s28 = sshll.u32 %s4791_s19, 4  ;;  %s4600_s28 = int_to_ptr.vmem [resolvable:$false] %s4599_s28 }
 0x105   : > { %s4601_s10 = scalar_lea.vmem %s4600_s28, 8192  ;;  %p4602_p2 = scmp.lt.s32.totalorder %s5290_s2, %s4600_s28 }
 0x106   : > { %p4597_p11 = pnand %p4595_p10, %p6021_p3  ;;  %p4603_p9 = scmp.lt.s32.totalorder %s4601_s10, %s4594_s0 }
 0x108   : > { %p4598_p6 = pneg %p4597_p11  ;;  %p4604_p7 = por %p4603_p9, %p4602_p2 }
 0x10a   : > { %p4605_p4 = pnand %p4604_p7, %p4598_p6 }
 0x10c   : > { %4608 = shalt.err (!%p4605_p4)
}
 0x10d   : > { %s4792_s24 = smov 256   ;;  %s4793_s22 = smov 16  }
 0x10e   : > { %s6025_s3 = scalar_lea.sflag [#allocation13], %s4998_s17  ;;  %s6026_s16 = sld [smem:[#allocation59_spill]] }
 0x10f   : > { %4137 = dma.hbm_to_vmem [thread:$0]  (!%p6022_p13), %s5288_s23, 4096, %s5290_s2, %s6025_s3, %s4792_s24, %s4792_s24, %s4793_s22  }
 0x110   : > { %s806_s4 = scalar_lea.vmem [#allocation15], %s3723_s30  ;;  %s803_s6 = scalar_lea.sflag [#allocation16], %s5053_s12 }
 0x111   : > { %s813_s21 = sshll.u32 %s806_s4, 4  ;;  %s5324_s21 = int_to_ptr.vmem [resolvable:$true] %s813_s21 }
 0x114   : > { %s5320_s18 = scalar_lea.hbm %s6026_s16, %s3869_s25  ;;  %s4614_s25 = scalar_lea.hbm %s6026_s16, 8192 }
 0x115   : > { %s4609_s26 = scalar_lea.hbm %s5320_s18, 4096  ;;  %p4615_p12 = scmp.lt.u32.totalorder %s5320_s18, %s6026_s16 }
 0x116   : > { %p4610_p8 = scmp.ne.s32.totalorder %s5320_s18, %s4609_s26  ;;  %p4616_p0 = scmp.lt.u32.totalorder %s4614_s25, %s4609_s26 }
 0x117   : > { %p4618_p11 = scmp.lt.u32.totalorder %s4609_s26, %s5320_s18 }
 0x118   : > { %p4612_p5 = pnand %p4610_p8, %p6021_p3  ;;  %p4617_p10 = por %p4616_p0, %p4615_p12 }
 0x11a   : > { %p4613_p1 = pneg %p4612_p5  ;;  %p4619_p6 = por %p4618_p11, %p4617_p10 }
 0x11c   : > { %p4620_p2 = pnand %p4619_p6, %p4613_p1 }
 0x11e   : > { %4623 = shalt.err (!%p4620_p2)
}
 0x11f   : > { %s4624_s30 = scalar_lea.vmem %s5324_s21, 4096  ;;  %s4794_s19 = smov [#allocation15]  }
 0x120   : > { %p4625_p9 = scmp.ne.s32.totalorder %s5324_s21, %s4624_s30  ;;  %s4629_s28 = sshll.u32 %s4794_s19, 4  ;;  %s4630_s28 = int_to_ptr.vmem [resolvable:$false] %s4629_s28 }
 0x121   : > { %s4631_s10 = scalar_lea.vmem %s4630_s28, 8192  ;;  %p4632_p8 = scmp.lt.s32.totalorder %s5324_s21, %s4630_s28 }
 0x122   : > { %p4627_p7 = pnand %p4625_p9, %p6021_p3  ;;  %p4633_p5 = scmp.lt.s32.totalorder %s4631_s10, %s4624_s30 }
 0x124   : > { %p4628_p4 = pneg %p4627_p7  ;;  %p4634_p12 = por %p4633_p5, %p4632_p8 }
 0x126   : > { %p4635_p0 = pnand %p4634_p12, %p4628_p4 }
 0x128   : > { %4638 = shalt.err (!%p4635_p0)
}
 0x129   : > { %4140 = dma.hbm_to_vmem [thread:$0]  (!%p6022_p13), %s5320_s18, 4096, %s5324_s21, %s803_s6, %s6016_s5, %s6016_s5, %s6015_s1  }
 0x12a   : > { %p6027_p3 = scmp.ne.s32.totalorder %s6010_s7, 0 }
 0x12b   : > { %p6028_p1 = scmp.eq.s32.totalorder (!%p6027_p3), %s5140_s20, 0 }
 0x12c   : > { %831 = sbr.rel (%p6027_p3) target bundleno = 2904 (0xb58), region = 100 }
 0x133   : > { %4712 = dma.done.wait (%p6028_p1), [#allocation4], 128   ;;  %p6029_p10 = pmov %p6028_p1 }
 0x134   : > { %s6030_s29 = sld [smem:[#allocation28_spill]]  ;;  %s6031_s9 = sld [smem:[#allocation39_spill]] }
 0x135   : > { %4714 = vsyncadd (%p6029_p10), [#allocation4], 4294967168  ;;  %s837_s24 = sand.u32 1, %s5140_s20  }
 0x136   : > { %s838_s1 = scalar_lea.sflag [#allocation7], %s837_s24 }
 0x13a   : > { %s5953_s22 = sand.u32 1, %s6030_s29   ;;  %p6032_p13 = scmp.ne.s32.totalorder %s6031_s9, 0 }
 0x13b   : > { %s5363_s12 = sshll.u32 %s5953_s22, 3 }
 0x13c   : > { %4716 = dma.done.wait (%p6032_p13), %s838_s1, 128  }
 0x13d   : > { %4718 = vsyncadd (%p6032_p13), %s838_s1, 4294967168  ;;  %s6033_s7 = sld [smem:[#allocation25_spill]]  ;;  %s6034_s3 = sld [smem:[#allocation40_spill]] }
 0x143   : > { %s848_s11 = sand.u32 1, %s6033_s7   ;;  %p6035_p11 = scmp.ne.s32.totalorder %s6034_s3, 0 }
 0x144   : > { %s3732_s13 = sshll.u32 %s848_s11, 6 }
 0x145   : > { %s5371_s18 = scalar_lea.vmem [#allocation8], %s3732_s13 }
 0x146   : > { %4720 = dma.done.wait (%p6035_p11), %s838_s1, 1024  }
 0x147   : > { %4722 = vsyncadd (%p6035_p11), %s838_s1, 4294966272  ;;  %s856_s20 = scalar_lea.sflag [#allocation10], %s837_s24  ;;  %s5377_s4 = scalar_lea.vmem [#allocation9], %s3732_s13 }
 0x148   : > { %4724 = dma.done.wait (%p6035_p11), %s856_s20, 2048  }
 0x149   : > { %4726 = vsyncadd (%p6035_p11), %s856_s20, 4294965248  ;;  %s5383_s21 = scalar_lea.vmem [#allocation11], %s3732_s13  ;;  %s874_s6 = scalar_lea.sflag [#allocation13], %s837_s24 }
 0x14a   : > { %s5385_s26 = scalar_lea.vmem [#allocation12], %s3732_s13 }
 0x14b   : > { %4728 = dma.done.wait (%p6035_p11), %s874_s6, 5120  }
 0x14c   : > { %4730 = vsyncadd (%p6035_p11), %s874_s6, 4294962176  ;;  %s3736_s17 = sshll.u32 %s848_s11, 8  ;;  %s892_s25 = scalar_lea.sflag [#allocation16], %s848_s11 }
 0x14d   : > { %s5391_s2 = scalar_lea.vmem [#allocation14], %s3736_s17  ;;  %s5393_s23 = scalar_lea.vmem [#allocation15], %s3736_s17 }
 0x14e   : > { %4732 = dma.done.wait (%p6035_p11), %s892_s25, 4096  }
 0x14f   : > { %4734 = vsyncadd (%p6035_p11), %s892_s25, 4294963200  ;;  %s6036_s0 = sld [smem:[#allocation30_spill]]  ;;  %s6041_s5 = sld [smem:[#allocation52_spill]] }
 0x150   : > { %s6042_s16 = sld [smem:[#allocation54_spill]]  ;;  %s6043_s9 = sld [smem:[#allocation55_spill]] }
 0x151   : > { %s6044_s3 = sld [smem:[#allocation56_spill]]  ;;  %s6045_s17 = sld [smem:[#allocation60_spill]] }
 0x152   : > { %s1012_s14 = scalar_lea.vmem [#allocation17], %s5363_s12 }
 0x155   : > { %p1013_p6 = scmp.lt.s32.totalorder %s6036_s0, 1  ;;  %p3740_p2 = scmp.ne.s32.totalorder %s6036_s0, 0 }
 0x157   : > { %s5401_s30 = scalar_select %p1013_p6, %s6036_s0, 1 }
 0x159   : > { %s1027_s8 = scalar_lea.vmem %s6041_s5, %s5401_s30  ;;  %s1030_s10 = scalar_lea.vmem %s6042_s16, %s5401_s30 }
 0x15a   : > { %s1033_s24 = scalar_lea.vmem %s6043_s9, %s5401_s30  ;;  %s1036_s11 = scalar_lea.vmem %s6044_s3, %s5401_s30 }
 0x15b   : > { %s3739_s13 = sshll.u32 %s5401_s30, 2  ;;  %s1043_s25 = scalar_lea.vmem %s6045_s17, %s5401_s30 }
 0x15c   : > { %s6046_s5 = sld [smem:[#allocation58_spill]]  ;;  %1048 = sbr.rel (%p3740_p2) target bundleno = 355 (0x163), region = 136 }
 0x15d   : > { %s6047_s16 = scalar_lea.vmem (!%p3740_p2), [#allocation6], %s5363_s12 }
 0x15e   : > { %v1049_v0 = vld [vmem:[%s6047_s16] sm:$0xff] (!%p3740_p2) }
 0x15f   : > { %1050 = vst [vmem:[#allocation2] sm:$0xff] (!%p3740_p2), %v1049_v0 }
 0x162   : > { %s5443_s28 = scalar_lea.vmem %s6046_s5, %s3739_s13 }
 0x163 PF: > { %v4795_v3 = vmov 0.0   ;;  %v4250_v4 = vld [vmem:[%s5371_s18] sm:$0xff]   ;;  %v4252_v6 = vld [vmem:[%s5371_s18 + $0x8] sm:$0xff]   ;;  %v4254_v8 = vld [vmem:[%s5371_s18 + $0x10] sm:$0xff]   ;;  %vm4796_vm0 = vmmov 0   ;;  %s6050_s7 = sld [smem:[#allocation46_spill]]  ;;  %v1428_v0 = vlaneseq }
 0x164   : > { %3967 = vmatprep.subr.bf16.mxu0 %v4795_v3  ;;  %3987 = vmatprep.subr.bf16.mxu1 %v4795_v3  ;;  %v4251_v5 = vld [vmem:[%s5377_s4] sm:$0xff]   ;;  %v4253_v7 = vld [vmem:[%s5377_s4 + $0x8] sm:$0xff]   ;;  %v4255_v9 = vld [vmem:[%s5377_s4 + $0x10] sm:$0xff]   ;;  %s6052_s1 = sld [smem:[#allocation50_spill]]  ;;  %s6054_s17 = sld [smem:[#allocation48_spill]]  ;;  %vm1925_vm1 = vcmask 261120  }
 0x165   : > { %3968 = vmatpush3.bf16.msra.mxu0 %v4250_v4  ;;  %3988 = vmatpush3.bf16.msra.mxu1 %v4251_v5  ;;  %v4256_v10 = vld [vmem:[%s5371_s18 + $0x18] sm:$0xff]   ;;  %v4258_v12 = vld [vmem:[%s5371_s18 + $0x20] sm:$0xff]   ;;  %v4260_v14 = vld [vmem:[%s5371_s18 + $0x28] sm:$0xff]   ;;  %s4798_s5 = smov 96   ;;  %s4799_s16 = smov 64   ;;  %v5543_v5 = vshrl.u32 %v1428_v0, 7 }
 0x166   : > { %v5449_v1 = vld [vmem:[#allocation2] sm:$0xff]  ;;  %3969 = vmatprep.subr.bf16.mxu0 %v4795_v3  ;;  %3989 = vmatprep.subr.bf16.mxu1 %v4795_v3  ;;  %v4257_v11 = vld [vmem:[%s5377_s4 + $0x18] sm:$0xff]   ;;  %v4261_v15 = vld [vmem:[%s5377_s4 + $0x28] sm:$0xff]   ;;  %v4800_v62 = vmov 1983009808   ;;  %vm2110_vm2 = vcmask 64512  }
 0x167   : > { %1054 = vadd.xlane.f32.xlu0 %v5449_v1  ;;  %v1058_v2 = vmul.f32 %v5449_v1, %v5449_v1  ;;  %v4259_v13 = vld [vmem:[%s5377_s4 + $0x20] sm:$0xff]   ;;  %3983 = vmatprep.mubr.msk.bf16.mxu0 %vm4796_vm0, %v4795_v3  ;;  %v4262_v16 = vld [vmem:[%s5371_s18 + $0x30] sm:$0xff]   ;;  %v4264_v18 = vld [vmem:[%s5371_s18 + $0x38] sm:$0xff]   ;;  %s6048_s18 = sld [smem:[#allocation45_spill]]  ;;  %v1426_v63 = vunpack.c.l.s4 %v4800_v62  ;;  %vm2162_vm3 = vcmask 1043456   ;;  %vm2515_vm4 = vcmask 523264  }
 0x168   : > { %4003 = vmatprep.mubr.msk.bf16.mxu1 %vm4796_vm0, %v4795_v3  ;;  %v4263_v17 = vld [vmem:[%s5377_s4 + $0x30] sm:$0xff]   ;;  %v4265_v19 = vld [vmem:[%s5377_s4 + $0x38] sm:$0xff]   ;;  %v4266_v34 = vld [vmem:[%s5383_s21] sm:$0xff]   ;;  %vm2518_vm5 = vcmask 785408  }
 0x169   : > { %3970 = vmatpush3.bf16.msra.mxu0 %v4252_v6  ;;  %3990 = vmatpush3.bf16.msra.mxu1 %v4253_v7  ;;  %s6051_s20 = scalar_lea.vmem %s6050_s7, %s5401_s30  ;;  %v4267_v36 = vld [vmem:[%s5383_s21 + $0x8] sm:$0xff]   ;;  %v4268_v37 = vld [vmem:[%s5383_s21 + $0x10] sm:$0xff]   ;;  %v4269_v38 = vld [vmem:[%s5383_s21 + $0x18] sm:$0xff]   ;;  %v1427_v4 = vunpack.c.0.s8 %v1426_v63 }
 0x16a   : > { %3971 = vmatprep.subr.bf16.mxu0 %v4795_v3  ;;  %3991 = vmatprep.subr.bf16.mxu1 %v4795_v3  ;;  %v3742_v31 = vld [vmem:[%s6051_s20] ss:$0 sm:$0xff]  ;;  %v4271_v40 = vld [vmem:[%s5383_s21 + $0x28] sm:$0xff]   ;;  %v4272_v41 = vld [vmem:[%s5383_s21 + $0x30] sm:$0xff]   ;;  %s6053_s3 = scalar_lea.vmem %s6052_s1, %s5401_s30  ;;  %s6055_s22 = scalar_lea.vmem %s6054_s17, %s5401_s30 }
 0x16b   : > { %1059 = vadd.xlane.f32.xlu0 %v1058_v2  ;;  %v4270_v39 = vld [vmem:[%s5383_s21 + $0x20] sm:$0xff]   ;;  %v4273_v42 = vld [vmem:[%s5383_s21 + $0x38] sm:$0xff]   ;;  %s4797_s21 = smov 32   ;;  %v5546_v7 = vsub.s32 %v1427_v4, %v5543_v5 }
 0x16c   : > { %v3752_v43 = vld [vmem:[%s6053_s3] ss:$0 sm:$0xff] }
 0x16d   : > { %3972 = vmatpush3.bf16.msra.mxu0 %v4254_v8  ;;  %3992 = vmatpush3.bf16.msra.mxu1 %v4255_v9  ;;  %s6049_s4 = scalar_lea.vmem %s6048_s18, %s5401_s30  ;;  %v3743_v44 = vld [vmem:[%s6055_s22] ss:$0 sm:$0xff] }
 0x16e   : > { %3973 = vmatprep.subr.bf16.mxu0 %v4795_v3  ;;  %3993 = vmatprep.subr.bf16.mxu1 %v4795_v3  ;;  %v3741_v29 = vld [vmem:[%s6049_s4] ss:$0 sm:$0xff] }
 0x171   : > { %3974 = vmatpush3.bf16.msra.mxu0 %v4256_v10  ;;  %3994 = vmatpush3.bf16.msra.mxu1 %v4257_v11 }
 0x172   : > { %3975 = vmatprep.subr.bf16.mxu0 %v4795_v3  ;;  %3995 = vmatprep.subr.bf16.mxu1 %v4795_v3 }
 0x175   : > { %3976 = vmatpush3.bf16.msra.mxu0 %v4258_v12  ;;  %3996 = vmatpush3.bf16.msra.mxu1 %v4259_v13 }
 0x176   : > { %3977 = vmatprep.subr.bf16.mxu0 %v4795_v3  ;;  %3997 = vmatprep.subr.bf16.mxu1 %v4795_v3 }
 0x179   : > { %3978 = vmatpush3.bf16.msra.mxu0 %v4260_v14  ;;  %3998 = vmatpush3.bf16.msra.mxu1 %v4261_v15 }
 0x17a   : > { %3979 = vmatprep.subr.bf16.mxu0 %v4795_v3  ;;  %3999 = vmatprep.subr.bf16.mxu1 %v4795_v3 }
 0x17d   : > { %3980 = vmatpush3.bf16.msra.mxu0 %v4262_v16  ;;  %4000 = vmatpush3.bf16.msra.mxu1 %v4263_v17 }
 0x17e   : > { %3981 = vmatprep.subr.bf16.mxu0 %v4795_v3  ;;  %4001 = vmatprep.subr.bf16.mxu1 %v4795_v3 }
 0x181   : > { %3982 = vmatpush3.bf16.msra.mxu0 %v4264_v18  ;;  %4002 = vmatpush3.bf16.msra.mxu1 %v4265_v19 }
 0x182   : > { %4007 = vmatprep.subr.bf16.mxu0 %v4795_v3  ;;  %4027 = vmatprep.subr.bf16.mxu1 %v4795_v3 }
 0x1f4   : > { %v1055_v20 = vpop.xlane.xlu0 %1054 }
 0x1f5   : > { %v1057_v21 = vmul.f32 0.0078125, %v1055_v20  ;;  %v4802_v20 = vmov 0  }
 0x1f7   : > { %v1062_v23 = vmul.f32 %v1057_v21, %v1057_v21  ;;  %v1064_v27 = vsub.f32 %v5449_v1, %v1057_v21  ;;  %v4801_v1 = vmov 1934713408  }
 0x1f8   : > { %v1060_v22 = vpop.xlane.xlu0 %1059  ;;  %v1443_v2 = vunpack.c.l.s4 %v4801_v1 }
 0x1f9   : > { %v1061_v24 = vmul.f32 0.0078125, %v1060_v22 }
 0x1fa   : > { %v1444_v6 = vunpack.c.0.s8 %v1443_v2 }
 0x1fb   : > { %v1063_v25 = vsub.f32 %v1061_v24, %v1062_v23 }
 0x1fc   : > { %v5550_v11 = vsub.s32 %v1444_v6, %v5543_v5 }
 0x1fd   : > { %v1065_v26 = vadd.f32 1e-05, %v1063_v25 }
 0x1ff   : > { %4362 = vrsqrt.f32 %v1065_v26 }
 0x209   : > { %v4363_v28 = vpop.eup %4362 }
 0x20a   : > { %v1067_v30 = vmul.f32 %v4363_v28, %v1064_v27 }
 0x20c   : > { %v1074_v32 = vmul.f32 %v3741_v29, %v1067_v30 }
 0x20e   : > { %v1081_v33 = vadd.f32 %v3742_v31, %v1074_v32 }
 0x210   : > { %v1082_v35 = vpack.c.bf16 %v1081_v33, %v1081_v33 }
 0x212   : > { %3984 = vmatmul.mubr.bf16.vlgmr.msra.gmra.mrb[0].mxu0 %v1082_v35  ;;  %4004 = vmatmul.mubr.bf16.vlgmr.msra.gmra.mrb[0].mxu1 %v1082_v35 }
 0x213   : > { %4008 = vmatpush3.bf16.msra.mxu0 %v4266_v34  ;;  %4023 = vmatprep.mubr.msk.bf16.mxu0 %vm4796_vm0, %v4795_v3 }
 0x214   : > { %4009 = vmatprep.subr.bf16.mxu0 %v4795_v3  ;;  %4029 = vmatprep.mubr.msk.bf16.mxu1 %vm4796_vm0, %v4795_v3 }
 0x217   : > { %4010 = vmatpush3.bf16.msra.mxu0 %v4267_v36 }
 0x218   : > { %4011 = vmatprep.subr.bf16.mxu0 %v4795_v3 }
 0x21b   : > { %4012 = vmatpush3.bf16.msra.mxu0 %v4268_v37 }
 0x21c   : > { %4013 = vmatprep.subr.bf16.mxu0 %v4795_v3 }
 0x21f   : > { %4014 = vmatpush3.bf16.msra.mxu0 %v4269_v38 }
 0x220   : > { %4015 = vmatprep.subr.bf16.mxu0 %v4795_v3 }
 0x223   : > { %4016 = vmatpush3.bf16.msra.mxu0 %v4270_v39 }
 0x224   : > { %4017 = vmatprep.subr.bf16.mxu0 %v4795_v3 }
 0x227   : > { %4018 = vmatpush3.bf16.msra.mxu0 %v4271_v40 }
 0x228   : > { %4019 = vmatprep.subr.bf16.mxu0 %v4795_v3 }
 0x22b   : > { %4020 = vmatpush3.bf16.msra.mxu0 %v4272_v41 }
 0x22c   : > { %4021 = vmatprep.subr.bf16.mxu0 %v4795_v3 }
 0x22f   : > { %4022 = vmatpush3.bf16.msra.mxu0 %v4273_v42 }
 0x230   : > { %4075 = vmatprep.subr.bf16.mxu0 %v4795_v3 }
 0x232   : > { %4024 = vmatmul.mubr.bf16.vlgmr.msra.gmra.mrb[4].mxu0 %v1082_v35 }
 0x233   : > { %4091 = vmatprep.mubr.msk.bf16.mxu0 %vm4796_vm0, %v4795_v3 }
 0x2e5   : > { %v1188_v45 = vpop.f32.mrb[0].mxu0  ;;  %v1299_v46 = vpop.f32.mrb[0].mxu1 }
 0x2e6   : > { %v1300_v47 = vadd.f32 %v3752_v43, %v1299_v46  ;;  %v3985_v48 = vpop.f32.mrb[1].mxu0  ;;  %v4005_v49 = vpop.f32.mrb[1].mxu1  ;;  %v1189_v52 = vadd.f32 %v3743_v44, %v1188_v45 }
 0x2e7   : > { %v1191_v50 = vpop.f32.mrb[2].mxu0  ;;  %v1302_v51 = vpop.f32.mrb[2].mxu1 }
 0x2e8   : > { %v1586_v53 = vpack.c.bf16 %v1300_v47, %v1300_v47  ;;  %v3986_v54 = vpop.f32.mrb[3].mxu0  ;;  %v4006_v55 = vpop.f32.mrb[3].mxu1  ;;  %v1416_v56 = vmul.f32 0.17677669, %v1189_v52 }
 0x2ea   : > { %1592 = vrot.lane.b32.xlu0 %v1586_v53, %s4797_s21  ;;  %1588 = vrot.lane.b32.xlu1 %v1586_v53, %s4798_s5  ;;  %v1417_v57 = vpack.c.bf16 %v1416_v56, %v1416_v56  ;;  %v1600_v19 = vrot.slane %v1586_v53, %v5546_v7 }
 0x2ec   : > { %v1431_v31 = vrot.slane %v1417_v57, %v5546_v7 }
 0x2ee   : > { %1590 = vrot.lane.b32.xlu1 %v1586_v53, %s4799_s16 }
 0x2f2   : > { %1419 = vrot.lane.b32.xlu1 %v1417_v57, %s4798_s5 }
 0x2f6   : > { %1421 = vrot.lane.b32.xlu1 %v1417_v57, %s4799_s16 }
 0x2fa   : > { %1423 = vrot.lane.b32.xlu1 %v1417_v57, %s4797_s21 }
 0x305   : > { %v5541_v58 = vpop.f32.mrb[4].mxu0 }
 0x306   : > { %v4025_v59 = vpop.f32.mrb[5].mxu0 }
 0x307   : > { %v1413_v60 = vpop.f32.mrb[6].mxu0 }
 0x308   : > { %v4026_v61 = vpop.f32.mrb[7].mxu0 }
 0x35c   : > { %v1593_v8 = vpop.permute.xlu0 %1592  ;;  %v1589_v9 = vpop.permute.xlu1 %1588 }
 0x35d   : > { %v1642_v10 = vrot.slane %v1593_v8, %v5546_v7  ;;  %v1634_v12 = vrot.slane %v1589_v9, %v5546_v7 }
 0x35f   : > { %v1643_v13 = vcombine.low %v1634_v12, %v1642_v10  ;;  %v1644_v14 = vcombine.high %v1634_v12, %v1642_v10 }
 0x360   : > { %v1591_v15 = vpop.permute.xlu1 %1590 }
 0x361   : > { %v1651_v16 = vrot.slane %v1643_v13, %v5550_v11  ;;  %v1658_v17 = vrot.slane %v1644_v14, %v5550_v11  ;;  %v1608_v18 = vrot.slane %v1591_v15, %v5546_v7 }
 0x363   : > { %v1659_v21 = vcombine.high %v1651_v16, %v4802_v20  ;;  %v1609_v22 = vcombine.low %v1600_v19, %v1608_v18  ;;  %v1610_v23 = vcombine.high %v1600_v19, %v1608_v18  ;;  %v1660_v25 = vcombine.high %v1658_v17, %v4802_v20 }
 0x364   : > { %v1420_v24 = vpop.permute.xlu1 %1419  ;;  %v1666_v28 = vshrl.u32 %v1651_v16, 16  ;;  %v1682_v30 = vshrl.u32 %v1658_v17, 16 }
 0x365   : > { %v1617_v26 = vrot.slane %v1609_v22, %v5550_v11  ;;  %v1624_v27 = vrot.slane %v1610_v23, %v5550_v11  ;;  %v1674_v29 = vshrl.u32 %v1659_v21, 16  ;;  %v1690_v37 = vshrl.u32 %v1660_v25, 16 }
 0x366   : > { %v1465_v56 = vrot.slane %v1420_v24, %v5546_v7 }
 0x367   : > { %v1625_v32 = vcombine.high %v1617_v26, %v4802_v20  ;;  %v1626_v33 = vcombine.high %v1624_v27, %v4802_v20  ;;  %v1663_v34 = vpack.i.b16 %v1651_v16, %v1617_v26  ;;  %v1665_v35 = vshrl.u32 %v1617_v26, 16 }
 0x368   : > { %v1422_v36 = vpop.permute.xlu1 %1421  ;;  %v1679_v38 = vpack.i.b16 %v1658_v17, %v1624_v27  ;;  %v1681_v39 = vshrl.u32 %v1624_v27, 16 }
 0x369   : > { %v1439_v40 = vrot.slane %v1422_v36, %v5546_v7  ;;  %v1667_v41 = vpack.i.b16 %v1666_v28, %v1665_v35  ;;  %v1671_v42 = vpack.i.b16 %v1659_v21, %v1625_v32  ;;  %v1673_v43 = vshrl.u32 %v1625_v32, 16 }
 0x36a   : > { %v1687_v44 = vpack.i.b16 %v1660_v25, %v1626_v33  ;;  %v1683_v45 = vpack.i.b16 %v1682_v30, %v1681_v39  ;;  %v1689_v46 = vshrl.u32 %v1626_v33, 16  ;;  %v1693_v47 = vcombine.low %v1663_v34, %v1679_v38 }
 0x36b   : > { %v1440_v48 = vcombine.low %v1431_v31, %v1439_v40  ;;  %v1675_v49 = vpack.i.b16 %v1674_v29, %v1673_v43  ;;  %v1441_v51 = vcombine.high %v1431_v31, %v1439_v40 }
 0x36c   : > { %v1701_v50 = vcombine.low %v1671_v42, %v1687_v44  ;;  %v1424_v52 = vpop.permute.xlu1 %1423  ;;  %v1691_v53 = vpack.i.b16 %v1690_v37, %v1689_v46  ;;  %v1718_v54 = vcombine.low %v1667_v41, %v1683_v45  ;;  %v1700_v61 = vrot.slane %v1693_v47, %v5546_v7 }
 0x36d   : > { %v1448_v55 = vrot.slane %v1440_v48, %v5550_v11  ;;  %v1455_v57 = vrot.slane %v1441_v51, %v5550_v11  ;;  %v1473_v59 = vrot.slane %v1424_v52, %v5546_v7 }
 0x36e   : > { %v1708_v60 = vrot.slane %v1701_v50, %v5546_v7  ;;  %v1726_v62 = vcombine.low %v1675_v49, %v1691_v53  ;;  %v1725_v6 = vrot.slane %v1718_v54, %v5546_v7 }
 0x36f   : > { %v1456_v63 = vcombine.high %v1448_v55, %v4802_v20  ;;  %v1457_v0 = vcombine.high %v1455_v57, %v4802_v20  ;;  %v1474_v1 = vcombine.low %v1465_v56, %v1473_v59  ;;  %v1475_v2 = vcombine.high %v1465_v56, %v1473_v59 }
 0x370   : > { %v1709_v4 = vcombine.low %v1700_v61, %v1708_v60  ;;  %v1733_v8 = vrot.slane %v1726_v62, %v5546_v7  ;;  %v1496_v9 = vshrl.u32 %v1448_v55, 16  ;;  %v1512_v14 = vshrl.u32 %v1455_v57, 16 }
 0x371   : > { %v1482_v10 = vrot.slane %v1474_v1, %v5550_v11  ;;  %v1489_v12 = vrot.slane %v1475_v2, %v5550_v11  ;;  %v1504_v13 = vshrl.u32 %v1456_v63, 16  ;;  %v1520_v15 = vshrl.u32 %v1457_v0, 16 }
 0x372   : > { %v1734_v16 = vcombine.low %v1725_v6, %v1733_v8  ;;  %v1716_v24 = vrot.slane %v1709_v4, %v5550_v11 }
 0x373   : > { %v1490_v17 = vcombine.high %v1482_v10, %v4802_v20  ;;  %v1491_v18 = vcombine.high %v1489_v12, %v4802_v20  ;;  %v1494_v19 = vpack.i.b16 %v1482_v10, %v1448_v55  ;;  %v1497_v21 = vshrl.u32 %v1482_v10, 16  ;;  %v1924_v10 = vld [vmem:[#allocation3] sm:$0xff] }
 0x374   : > { %v1510_v22 = vpack.i.b16 %v1489_v12, %v1455_v57  ;;  %v1513_v23 = vshrl.u32 %v1489_v12, 16  ;;  %v1741_v25 = vrot.slane %v1734_v16, %v5550_v11  ;;  %v1746_v47 = vshrl.u32 %v1716_v24, 16 }
 0x375   : > { %v1498_v26 = vpack.i.b16 %v1497_v21, %v1496_v9  ;;  %v1502_v27 = vpack.i.b16 %v1490_v17, %v1456_v63  ;;  %v1505_v28 = vshrl.u32 %v1490_v17, 16  ;;  %v1518_v29 = vpack.i.b16 %v1491_v18, %v1457_v0 }
 0x376   : > { %v1514_v30 = vpack.i.b16 %v1513_v23, %v1512_v14  ;;  %v1521_v31 = vshrl.u32 %v1491_v18, 16  ;;  %v1524_v32 = vcombine.low %v1494_v19, %v1510_v22  ;;  %v1745_v33 = vpack.i.b16 %v1741_v25, %v1716_v24 }
 0x377   : > { %v1506_v34 = vpack.i.b16 %v1505_v28, %v1504_v13  ;;  %v1532_v35 = vcombine.low %v1502_v27, %v1518_v29  ;;  %v1747_v45 = vshrl.u32 %v1741_v25, 16  ;;  %v1742_v53 = vcombine.high %v1741_v25, %v4802_v20 }
 0x378   : > { %v1522_v36 = vpack.i.b16 %v1521_v31, %v1520_v15  ;;  %v1549_v37 = vcombine.low %v1498_v26, %v1514_v30  ;;  %v1930_v38 = vsel %vm1925_vm1, %v1745_v33, 0  ;;  %v1531_v40 = vrot.slane %v1524_v32, %v5546_v7 }
 0x379   : > { %v1539_v39 = vrot.slane %v1532_v35, %v5546_v7  ;;  %4028 = vmatpush3.bf16.xpose.msra.mxu1 %v1930_v38  ;;  %v1748_v50 = vpack.i.b16 %v1747_v45, %v1746_v47  ;;  %v1717_v55 = vcombine.high %v1716_v24, %v4802_v20  ;;  %v1753_v61 = vshrl.u32 %v1742_v53, 16 }
 0x37a   : > { %v1557_v41 = vcombine.low %v1506_v34, %v1522_v36  ;;  %4033 = vmatprep.subr.bf16.mxu1 %v4795_v3  ;;  %v1556_v43 = vrot.slane %v1549_v37, %v5546_v7  ;;  %v3761_v37 = vld [vmem:[%s1027_s8] ss:$0 sm:$0xff] }
 0x37b   : > { %v1540_v42 = vcombine.low %v1531_v40, %v1539_v39  ;;  %v1976_v52 = vsel %vm1925_vm1, %v1748_v50, 0  ;;  %v1751_v57 = vpack.i.b16 %v1742_v53, %v1717_v55  ;;  %v1752_v63 = vshrl.u32 %v1717_v55, 16 }
 0x37c   : > { %v1564_v44 = vrot.slane %v1557_v41, %v5546_v7  ;;  %v1411_v38 = vadd.f32 %v3761_v37, %v5541_v58 }
 0x37d   : > { %v1547_v48 = vrot.slane %v1540_v42, %v5550_v11  ;;  %v2022_v60 = vsel %vm1925_vm1, %v1751_v57, 0  ;;  %v1754_v1 = vpack.i.b16 %v1753_v61, %v1752_v63 }
 0x37e   : > { %v1565_v46 = vcombine.low %v1556_v43, %v1564_v44  ;;  %v1755_v39 = vpack.c.bf16 %v1411_v38, %v1411_v38 }
 0x37f   : > { %v1577_v56 = vshrl.u32 %v1547_v48, 16  ;;  %v1548_v0 = vcombine.high %v1547_v48, %v4802_v20  ;;  %v2068_v4 = vsel %vm1925_vm1, %v1754_v1, 0 }
 0x380   : > { %v1572_v49 = vrot.slane %v1565_v46, %v5550_v11 }
 0x381   : > { %v1583_v8 = vshrl.u32 %v1548_v0, 16 }
 0x382   : > { %v1576_v51 = vpack.i.b16 %v1572_v49, %v1547_v48  ;;  %v1578_v54 = vshrl.u32 %v1572_v49, 16  ;;  %v1573_v62 = vcombine.high %v1572_v49, %v4802_v20 }
 0x384   : > { %4030 = vmatmul.mubr.msk.bf16.vlgmr.msra.gmra.mrb[4].mxu1 %vm1925_vm1, %v1576_v51  ;;  %v1579_v59 = vpack.i.b16 %v1578_v54, %v1577_v56  ;;  %v1582_v2 = vpack.i.b16 %v1573_v62, %v1548_v0  ;;  %v1584_v6 = vshrl.u32 %v1573_v62, 16 }
 0x385   : > { %4034 = vmatpush3.bf16.xpose.msra.mxu1 %v1976_v52  ;;  %4035 = vmatprep.mubr.msk.bf16.mxu1 %vm4796_vm0, %v4795_v3 }
 0x386   : > { %4039 = vmatprep.subr.bf16.mxu1 %v4795_v3  ;;  %v1585_v9 = vpack.i.b16 %v1584_v6, %v1583_v8  ;;  %v1769_v8 = vrot.slane %v1755_v39, %v5546_v7 }
 0x38c   : > { %4036 = vmatmul.mubr.msk.bf16.vlgmr.msra.gmra.mrb[8].mxu1 %vm1925_vm1, %v1579_v59 }
 0x38d   : > { %4040 = vmatpush3.bf16.xpose.msra.mxu1 %v2022_v60  ;;  %4041 = vmatprep.mubr.msk.bf16.mxu1 %vm4796_vm0, %v4795_v3 }
 0x38e   : > { %4045 = vmatprep.subr.bf16.mxu1 %v4795_v3 }
 0x394   : > { %4042 = vmatmul.mubr.msk.bf16.vlgmr.msra.gmra.mrb[12].mxu1 %vm1925_vm1, %v1582_v2 }
 0x395   : > { %4046 = vmatpush3.bf16.xpose.msra.mxu1 %v2068_v4  ;;  %4047 = vmatprep.mubr.msk.bf16.mxu1 %vm4796_vm0, %v4795_v3 }
 0x396   : > { %4051 = vmatprep.subr.bf16.mxu1 %v4795_v3 }
 0x39c   : > { %4048 = vmatmul.mubr.msk.bf16.vlgmr.msra.gmra.mrb[16].mxu1 %vm1925_vm1, %v1585_v9 }
 0x39d   : > { %4053 = vmatprep.mubr.msk.bf16.mxu1 %vm4796_vm0, %v4795_v3 }
 0x457   : > { %v1966_v12 = vpop.f32.mrb[4].mxu1 }
 0x458   : > { %v1967_v13 = vadd.f32 %v1966_v12, %v1924_v10  ;;  %v4031_v14 = vpop.f32.mrb[5].mxu1 }
 0x459   : > { %v1969_v15 = vpop.f32.mrb[6].mxu1 }
 0x45a   : > { %v4032_v16 = vpop.f32.mrb[7].mxu1  ;;  %v2111_v17 = vsel %vm2110_vm2, %v1967_v13, -inf }
 0x45b   : > { %2112 = vmax.xlane.f32.xlu1 %v2111_v17 }
 0x45f   : > { %v2012_v18 = vpop.f32.mrb[8].mxu1 }
 0x460   : > { %v2013_v19 = vadd.f32 %v2012_v18, %v1924_v10  ;;  %v4037_v21 = vpop.f32.mrb[9].mxu1 }
 0x461   : > { %v2015_v22 = vpop.f32.mrb[10].mxu1 }
 0x462   : > { %v4038_v23 = vpop.f32.mrb[11].mxu1  ;;  %v2114_v24 = vsel %vm2110_vm2, %v2013_v19, -inf }
 0x463   : > { %2115 = vmax.xlane.f32.xlu0 %v2114_v24 }
 0x467   : > { %v2058_v25 = vpop.f32.mrb[12].mxu1 }
 0x468   : > { %v2059_v26 = vadd.f32 %v2058_v25, %v1924_v10  ;;  %v4043_v27 = vpop.f32.mrb[13].mxu1 }
 0x469   : > { %v2061_v28 = vpop.f32.mrb[14].mxu1 }
 0x46a   : > { %v4044_v29 = vpop.f32.mrb[15].mxu1  ;;  %v2117_v30 = vsel %vm2110_vm2, %v2059_v26, -inf }
 0x46b   : > { %2118 = vmax.xlane.f32.xlu1 %v2117_v30 }
 0x46f   : > { %v2104_v31 = vpop.f32.mrb[16].mxu1 }
 0x470   : > { %v2105_v32 = vadd.f32 %v2104_v31, %v1924_v10  ;;  %v4049_v33 = vpop.f32.mrb[17].mxu1 }
 0x471   : > { %v2107_v34 = vpop.f32.mrb[18].mxu1 }
 0x472   : > { %v4050_v35 = vpop.f32.mrb[19].mxu1  ;;  %v2120_v36 = vsel %vm2110_vm2, %v2105_v32, -inf }
 0x473   : > { %2121 = vmax.xlane.f32.xlu1 %v2120_v36 }
 0x484   : > { %1757 = vrot.lane.b32.xlu1 %v1755_v39, %s4798_s5 }
 0x488   : > { %1761 = vrot.lane.b32.xlu1 %v1755_v39, %s4797_s21 }
 0x4e8   : > { %v2113_v40 = vpop.xlane.xlu1 %2112 }
 0x4e9   : > { %v2123_v41 = vsub.f32 %v1967_v13, %v2113_v40 }
 0x4eb   : > { %v2127_v42 = vmul.f32 1.442695, %v2123_v41 }
 0x4ed   : > { %4364 = vpow2.f32 %v2127_v42 }
 0x4f0   : > { %v2116_v43 = vpop.xlane.xlu0 %2115 }
 0x4f1   : > { %v2124_v44 = vsub.f32 %v2013_v19, %v2116_v43 }
 0x4f3   : > { %v2129_v45 = vmul.f32 1.442695, %v2124_v44 }
 0x4f5   : > { %4366 = vpow2.f32 %v2129_v45 }
 0x4f7   : > { %v5623_v46 = vpop.eup %4364 }
 0x4f8   : > { %v2135_v47 = vsel %vm2110_vm2, %v5623_v46, 0.0  ;;  %v2119_v49 = vpop.xlane.xlu1 %2118 }
 0x4f9   : > { %2136 = vadd.xlane.f32.xlu0 %v2135_v47  ;;  %v2125_v50 = vsub.f32 %v2059_v26, %v2119_v49 }
 0x4fb   : > { %v2131_v52 = vmul.f32 1.442695, %v2125_v50 }
 0x4fd   : > { %4368 = vpow2.f32 %v2131_v52 }
 0x4ff   : > { %v5627_v58 = vpop.eup %4366 }
 0x500   : > { %v2138_v48 = vsel %vm2110_vm2, %v5627_v58, 0.0  ;;  %v2122_v51 = vpop.xlane.xlu1 %2121 }
 0x501   : > { %2139 = vadd.xlane.f32.xlu1 %v2138_v48  ;;  %v2126_v53 = vsub.f32 %v2105_v32, %v2122_v51 }
 0x503   : > { %v2133_v54 = vmul.f32 1.442695, %v2126_v53 }
 0x504   : > { %v1758_v60 = vpop.permute.xlu1 %1757 }
 0x505   : > { %4370 = vpow2.f32 %v2133_v54  ;;  %v1803_v63 = vrot.slane %v1758_v60, %v5546_v7 }
 0x507   : > { %v5632_v55 = vpop.eup %4368 }
 0x508   : > { %v2141_v56 = vsel %vm2110_vm2, %v5632_v55, 0.0  ;;  %v1762_v61 = vpop.permute.xlu1 %1761 }
 0x509   : > { %v1811_v62 = vrot.slane %v1762_v61, %v5546_v7 }
 0x50b   : > { %v1812_v0 = vcombine.low %v1803_v63, %v1811_v62  ;;  %v1813_v2 = vcombine.high %v1803_v63, %v1811_v62 }
 0x50d   : > { %v1820_v4 = vrot.slane %v1812_v0, %v5550_v11  ;;  %v1827_v10 = vrot.slane %v1813_v2, %v5550_v11 }
 0x50f   : > { %1759 = vrot.lane.b32.xlu0 %v1755_v39, %s4799_s16  ;;  %v5636_v57 = vpop.eup %4370  ;;  %v1828_v14 = vcombine.high %v1820_v4, %v4802_v20  ;;  %v1829_v17 = vcombine.high %v1827_v10, %v4802_v20  ;;  %v1835_v18 = vshrl.u32 %v1820_v4, 16  ;;  %v1851_v19 = vshrl.u32 %v1827_v10, 16 }
 0x510   : > { %v2144_v59 = vsel %vm2110_vm2, %v5636_v57, 0.0 }
 0x511   : > { %v1843_v25 = vshrl.u32 %v1828_v14, 16  ;;  %v1859_v32 = vshrl.u32 %v1829_v17, 16 }
 0x52e   : > { %2142 = vadd.xlane.f32.xlu0 %v2141_v56 }
 0x532   : > { %2145 = vadd.xlane.f32.xlu0 %v2144_v59 }
 0x586   : > { %v2137_v1 = vpop.xlane.xlu0 %2136 }
 0x587   : > { %4372 = vrcp.f32 %v2137_v1 }
 0x58a   : > { %v1760_v6 = vpop.permute.xlu0 %1759 }
 0x58b   : > { %v1777_v9 = vrot.slane %v1760_v6, %v5546_v7 }
 0x58d   : > { %v1778_v12 = vcombine.low %v1769_v8, %v1777_v9  ;;  %v1779_v13 = vcombine.high %v1769_v8, %v1777_v9 }
 0x58e   : > { %v2140_v43 = vpop.xlane.xlu1 %2139 }
 0x58f   : > { %v1786_v15 = vrot.slane %v1778_v12, %v5550_v11  ;;  %v1793_v16 = vrot.slane %v1779_v13, %v5550_v11  ;;  %4374 = vrcp.f32 %v2140_v43 }
 0x591   : > { %v1794_v21 = vcombine.high %v1786_v15, %v4802_v20  ;;  %v1795_v22 = vcombine.high %v1793_v16, %v4802_v20  ;;  %v1832_v23 = vpack.i.b16 %v1820_v4, %v1786_v15  ;;  %v1834_v24 = vshrl.u32 %v1786_v15, 16  ;;  %v4373_v48 = vpop.eup %4372 }
 0x592   : > { %v1848_v26 = vpack.i.b16 %v1827_v10, %v1793_v16  ;;  %v1850_v27 = vshrl.u32 %v1793_v16, 16  ;;  %v2151_v52 = vmul.f32 %v4373_v48, %v5623_v46 }
 0x593   : > { %v1836_v28 = vpack.i.b16 %v1835_v18, %v1834_v24  ;;  %v1840_v29 = vpack.i.b16 %v1828_v14, %v1794_v21  ;;  %v1842_v30 = vshrl.u32 %v1794_v21, 16  ;;  %v1856_v31 = vpack.i.b16 %v1829_v17, %v1795_v22  ;;  %v4275_v21 = vld [vmem:[%s5385_s26 + $0x8] sm:$0xff]  }
 0x594   : > { %v1852_v33 = vpack.i.b16 %v1851_v19, %v1850_v27  ;;  %v1858_v34 = vshrl.u32 %v1795_v22, 16  ;;  %v1862_v35 = vcombine.low %v1832_v23, %v1848_v26  ;;  %v2155_v61 = vpack.c.bf16 %v2151_v52, %v2151_v52  ;;  %v4276_v22 = vld [vmem:[%s5385_s26 + $0x10] sm:$0xff]   ;;  %v4277_v23 = vld [vmem:[%s5385_s26 + $0x18] sm:$0xff]   ;;  %v4279_v24 = vld [vmem:[%s5385_s26 + $0x28] sm:$0xff]  }
 0x595   : > { %v1844_v36 = vpack.i.b16 %v1843_v25, %v1842_v30  ;;  %v1870_v37 = vcombine.low %v1840_v29, %v1856_v31  ;;  %v4280_v25 = vld [vmem:[%s5385_s26 + $0x30] sm:$0xff]  }
 0x596   : > { %v1860_v38 = vpack.i.b16 %v1859_v32, %v1858_v34  ;;  %v1887_v39 = vcombine.low %v1836_v28, %v1852_v33  ;;  %v1869_v40 = vrot.slane %v1862_v35, %v5546_v7 }
 0x597   : > { %v1877_v41 = vrot.slane %v1870_v37, %v5546_v7 }
 0x598   : > { %v1895_v42 = vcombine.low %v1844_v36, %v1860_v38  ;;  %v1894_v45 = vrot.slane %v1887_v39, %v5546_v7 }
 0x599   : > { %v1878_v44 = vcombine.low %v1869_v40, %v1877_v41  ;;  %v4375_v62 = vpop.eup %4374 }
 0x59a   : > { %v1902_v47 = vrot.slane %v1895_v42, %v5546_v7  ;;  %v2152_v46 = vmul.f32 %v4375_v62, %v5627_v58 }
 0x59b   : > { %v1885_v49 = vrot.slane %v1878_v44, %v5550_v11 }
 0x59c   : > { %v1903_v50 = vcombine.low %v1894_v45, %v1902_v47  ;;  %v2156_v4 = vpack.c.bf16 %v2152_v46, %v2152_v46 }
 0x59d   : > { %v1915_v54 = vshrl.u32 %v1885_v49, 16  ;;  %v1886_v1 = vcombine.high %v1885_v49, %v4802_v20 }
 0x59e   : > { %v1910_v51 = vrot.slane %v1903_v50, %v5550_v11 }
 0x59f   : > { %v1921_v10 = vshrl.u32 %v1886_v1, 16 }
 0x5a0   : > { %v1914_v53 = vpack.i.b16 %v1910_v51, %v1885_v49  ;;  %v1916_v56 = vshrl.u32 %v1910_v51, 16  ;;  %v1911_v0 = vcombine.high %v1910_v51, %v4802_v20 }
 0x5a2   : > { %v2164_v59 = vsel %vm2162_vm3, %v1914_v53, 0  ;;  %v1917_v60 = vpack.i.b16 %v1916_v56, %v1915_v54  ;;  %v1920_v2 = vpack.i.b16 %v1911_v0, %v1886_v1  ;;  %v1922_v58 = vshrl.u32 %v1911_v0, 16 }
 0x5a3   : > { %4052 = vmatpush3.bf16.msra.mxu1 %v2164_v59 }
 0x5a4   : > { %4057 = vmatprep.subr.bf16.mxu1 %v4795_v3  ;;  %v2210_v63 = vsel %vm2162_vm3, %v1917_v60, 0  ;;  %v2256_v6 = vsel %vm2162_vm3, %v1920_v2, 0  ;;  %v1923_v14 = vpack.i.b16 %v1922_v58, %v1921_v10 }
 0x5a6   : > { %4054 = vmatmul.mubr.msk.bf16.vlgmr.msra.gmra.mrb[20].mxu1 %vm2110_vm2, %v2155_v61  ;;  %v2302_v17 = vsel %vm2162_vm3, %v1923_v14, 0 }
 0x5a7   : > { %4058 = vmatpush3.bf16.msra.mxu1 %v2210_v63  ;;  %4059 = vmatprep.mubr.msk.bf16.mxu1 %vm4796_vm0, %v4795_v3 }
 0x5a8   : > { %4063 = vmatprep.subr.bf16.mxu1 %v4795_v3 }
 0x5ae   : > { %4060 = vmatmul.mubr.msk.bf16.vlgmr.msra.gmra.mrb[24].mxu1 %vm2110_vm2, %v2156_v4 }
 0x5af   : > { %4064 = vmatpush3.bf16.msra.mxu1 %v2256_v6  ;;  %4065 = vmatprep.mubr.msk.bf16.mxu1 %vm4796_vm0, %v4795_v3 }
 0x5b0   : > { %4069 = vmatprep.subr.bf16.mxu1 %v4795_v3 }
 0x5bb   : > { %v2143_v8 = vpop.xlane.xlu0 %2142 }
 0x5bc   : > { %4376 = vrcp.f32 %v2143_v8 }
 0x5bf   : > { %v2146_v9 = vpop.xlane.xlu0 %2145 }
 0x5c0   : > { %4378 = vrcp.f32 %v2146_v9 }
 0x5c6   : > { %v4377_v12 = vpop.eup %4376 }
 0x5c7   : > { %v2153_v13 = vmul.f32 %v4377_v12, %v5632_v55  ;;  %v4274_v55 = vld [vmem:[%s5385_s26] sm:$0xff]  }
 0x5c8   : > { %4076 = vmatpush3.bf16.msra.mxu0 %v4274_v55 }
 0x5c9   : > { %v2157_v15 = vpack.c.bf16 %v2153_v13, %v2153_v13  ;;  %4077 = vmatprep.subr.bf16.mxu0 %v4795_v3 }
 0x5ca   : > { %v4379_v16 = vpop.eup %4378 }
 0x5cb   : > { %4066 = vmatmul.mubr.msk.bf16.vlgmr.msra.gmra.mrb[28].mxu1 %vm2110_vm2, %v2157_v15  ;;  %v2154_v18 = vmul.f32 %v4379_v16, %v5636_v57  ;;  %v4278_v57 = vld [vmem:[%s5385_s26 + $0x20] sm:$0xff]  }
 0x5cc   : > { %4070 = vmatpush3.bf16.msra.mxu1 %v2302_v17  ;;  %4071 = vmatprep.mubr.msk.bf16.mxu1 %vm4796_vm0, %v4795_v3 }
 0x5cd   : > { %v2158_v19 = vpack.c.bf16 %v2154_v18, %v2154_v18  ;;  %4078 = vmatpush3.bf16.msra.mxu0 %v4275_v21 }
 0x5ce   : > { %4079 = vmatprep.subr.bf16.mxu0 %v4795_v3 }
 0x5d1   : > { %4080 = vmatpush3.bf16.msra.mxu0 %v4276_v22 }
 0x5d2   : > { %4081 = vmatprep.subr.bf16.mxu0 %v4795_v3 }
 0x5d3   : > { %4072 = vmatmul.mubr.msk.bf16.vlgmr.msra.gmra.mrb[32].mxu1 %vm2110_vm2, %v2158_v19 }
 0x5d4   : > { %2910 = vmatprep.mubr.bf16.mxu1 %v4802_v20 }
 0x5d5   : > { %4082 = vmatpush3.bf16.msra.mxu0 %v4277_v23 }
 0x5d6   : > { %4083 = vmatprep.subr.bf16.mxu0 %v4795_v3 }
 0x5d9   : > { %4084 = vmatpush3.bf16.msra.mxu0 %v4278_v57 }
 0x5da   : > { %4085 = vmatprep.subr.bf16.mxu0 %v4795_v3 }
 0x5dd   : > { %4086 = vmatpush3.bf16.msra.mxu0 %v4279_v24  ;;  %v4281_v24 = vld [vmem:[%s5385_s26 + $0x38] sm:$0xff]  }
 0x5de   : > { %4087 = vmatprep.subr.bf16.mxu0 %v4795_v3 }
 0x5e1   : > { %4088 = vmatpush3.bf16.msra.mxu0 %v4280_v25 }
 0x5e2   : > { %4089 = vmatprep.subr.bf16.mxu0 %v4795_v3 }
 0x5e5   : > { %4090 = vmatpush3.bf16.msra.mxu0 %v4281_v24  ;;  %v4327_v24 = vld [vmem:[%s5391_s2 + $0xe8] ss:$16 sps:$4 sm:$0xff]  }
 0x679   : > { %v2200_v26 = vpop.f32.mrb[20].mxu1 }
 0x67a   : > { %v4055_v27 = vpop.f32.mrb[21].mxu1  ;;  %v2344_v34 = vpack.c.bf16 %v2200_v26, %v2200_v26 }
 0x67b   : > { %v2203_v28 = vpop.f32.mrb[22].mxu1 }
 0x67c   : > { %v4056_v29 = vpop.f32.mrb[23].mxu1  ;;  %v2351_v39 = vrot.slane %v2344_v34, %v5546_v7 }
 0x681   : > { %v2246_v30 = vpop.f32.mrb[24].mxu1 }
 0x682   : > { %v4061_v31 = vpop.f32.mrb[25].mxu1  ;;  %v2378_v43 = vpack.c.bf16 %v2246_v30, %v2246_v30 }
 0x683   : > { %v2249_v32 = vpop.f32.mrb[26].mxu1 }
 0x684   : > { %v4062_v33 = vpop.f32.mrb[27].mxu1  ;;  %v2385_v51 = vrot.slane %v2378_v43, %v5546_v7 }
 0x69e   : > { %v2292_v35 = vpop.f32.mrb[28].mxu1 }
 0x69f   : > { %v2352_v36 = vpack.c.bf16 %v2292_v35, %v2292_v35  ;;  %v4067_v37 = vpop.f32.mrb[29].mxu1 }
 0x6a0   : > { %v2295_v38 = vpop.f32.mrb[30].mxu1 }
 0x6a1   : > { %v2359_v40 = vrot.slane %v2352_v36, %v5546_v7  ;;  %v4068_v41 = vpop.f32.mrb[31].mxu1 }
 0x6a3   : > { %v2360_v42 = vcombine.low %v2351_v39, %v2359_v40  ;;  %v2361_v3 = vcombine.high %v2351_v39, %v2359_v40 }
 0x6a5   : > { %v2368_v49 = vrot.slane %v2360_v42, %v5550_v11  ;;  %v2375_v53 = vrot.slane %v2361_v3, %v5550_v11 }
 0x6a6   : > { %v2338_v44 = vpop.f32.mrb[32].mxu1 }
 0x6a7   : > { %v4073_v45 = vpop.f32.mrb[33].mxu1  ;;  %v2386_v47 = vpack.c.bf16 %v2338_v44, %v2338_v44  ;;  %v2376_v59 = vcombine.high %v2368_v49, %v4802_v20  ;;  %v2377_v62 = vcombine.high %v2375_v53, %v4802_v20  ;;  %v2416_v63 = vshrl.u32 %v2368_v49, 16  ;;  %v4282_v44 = vld [vmem:[%s5391_s2] ss:$16 sps:$4 sm:$0xff]  }
 0x6a8   : > { %v2341_v48 = vpop.f32.mrb[34].mxu1  ;;  %v2432_v6 = vshrl.u32 %v2375_v53, 16  ;;  %v4284_v45 = vld [vmem:[%s5391_s2 + $0x4] ss:$16 sps:$4 sm:$0xff]  }
 0x6a9   : > { %v4074_v50 = vpop.f32.mrb[35].mxu1  ;;  %v2393_v52 = vrot.slane %v2386_v47, %v5546_v7  ;;  %v2424_v4 = vshrl.u32 %v2376_v59, 16  ;;  %v2440_v14 = vshrl.u32 %v2377_v62, 16  ;;  %v4285_v47 = vld [vmem:[%s5391_s2 + $0x8] ss:$16 sps:$4 sm:$0xff]   ;;  %2878 = vmatprep.subr.bf16.mxu1 %v4284_v45  ;;  %v4338_v45 = vld [vmem:[%s5393_s23 + $0x50] sm:$0xff]  }
 0x6aa   : > { %v4287_v48 = vld [vmem:[%s5391_s2 + $0xc] ss:$16 sps:$4 sm:$0xff]   ;;  %2879 = vmatpush1.bf16.msra.mxu1 %v4282_v44 }
 0x6ab   : > { %v2394_v54 = vcombine.low %v2385_v51, %v2393_v52  ;;  %v2395_v56 = vcombine.high %v2385_v51, %v2393_v52  ;;  %v4293_v50 = vld [vmem:[%s5391_s2 + $0x2c] ss:$16 sps:$4 sm:$0xff]   ;;  %2919 = vmatprep.subr.bf16.mxu0 %v4287_v48  ;;  %v4288_v51 = vld [vmem:[%s5391_s2 + $0x20] ss:$16 sps:$4 sm:$0xff]   ;;  %v4291_v52 = vld [vmem:[%s5391_s2 + $0x28] ss:$16 sps:$4 sm:$0xff]  }
 0x6ac   : > { %v4337_v44 = vld [vmem:[%s5393_s23 + $0x88] sm:$0xff]   ;;  %v4340_v48 = vld [vmem:[%s5393_s23 + $0x10] sm:$0xff]  }
 0x6ad   : > { %v2402_v60 = vrot.slane %v2394_v54, %v5550_v11  ;;  %v2409_v61 = vrot.slane %v2395_v56, %v5550_v11 }
 0x6af   : > { %v2410_v0 = vcombine.high %v2402_v60, %v4802_v20  ;;  %v2411_v46 = vcombine.high %v2409_v61, %v4802_v20  ;;  %v2414_v1 = vpack.i.b16 %v2402_v60, %v2368_v49  ;;  %v2417_v2 = vshrl.u32 %v2402_v60, 16  ;;  %v4290_v49 = vld [vmem:[%s5391_s2 + $0x24] ss:$16 sps:$4 sm:$0xff]  }
 0x6b0   : > { %v2430_v8 = vpack.i.b16 %v2409_v61, %v2375_v53  ;;  %v2433_v9 = vshrl.u32 %v2409_v61, 16  ;;  %2880 = vmatprep.subr.bf16.mxu1 %v4290_v49  ;;  %v4398_v60 = vld [vmem:[#allocation2] sm:$0xff]  ;;  %v4341_v49 = vld [vmem:[%s5393_s23 + $0x90] sm:$0xff]  }
 0x6b1   : > { %v2418_v58 = vpack.i.b16 %v2417_v2, %v2416_v63  ;;  %v2422_v10 = vpack.i.b16 %v2410_v0, %v2376_v59  ;;  %v2425_v12 = vshrl.u32 %v2410_v0, 16  ;;  %v2438_v13 = vpack.i.b16 %v2411_v46, %v2377_v62  ;;  %2881 = vmatpush1.bf16.msra.mxu1 %v4288_v51  ;;  %v4296_v0 = vld [vmem:[%s5391_s2 + $0x44] ss:$16 sps:$4 sm:$0xff]   ;;  %v4297_v2 = vld [vmem:[%s5391_s2 + $0x48] ss:$16 sps:$4 sm:$0xff]  }
 0x6b2   : > { %v2434_v15 = vpack.i.b16 %v2433_v9, %v2432_v6  ;;  %v2441_v16 = vshrl.u32 %v2411_v46, 16  ;;  %v2444_v17 = vcombine.low %v2414_v1, %v2430_v8  ;;  %v4299_v46 = vld [vmem:[%s5391_s2 + $0x4c] ss:$16 sps:$4 sm:$0xff]   ;;  %v4294_v1 = vld [vmem:[%s5391_s2 + $0x40] ss:$16 sps:$4 sm:$0xff]   ;;  %2882 = vmatprep.subr.bf16.mxu1 %v4296_v0 }
 0x6b3   : > { %v2426_v18 = vpack.i.b16 %v2425_v12, %v2424_v4  ;;  %v2452_v19 = vcombine.low %v2422_v10, %v2438_v13  ;;  %v4302_v4 = vld [vmem:[%s5391_s2 + $0x64] ss:$16 sps:$4 sm:$0xff]   ;;  %v4305_v6 = vld [vmem:[%s5391_s2 + $0x6c] ss:$16 sps:$4 sm:$0xff]   ;;  %v4300_v8 = vld [vmem:[%s5391_s2 + $0x60] ss:$16 sps:$4 sm:$0xff]  }
 0x6b4   : > { %v2442_v55 = vpack.i.b16 %v2441_v16, %v2440_v14  ;;  %v2469_v21 = vcombine.low %v2418_v58, %v2434_v15  ;;  %v2451_v22 = vrot.slane %v2444_v17, %v5546_v7  ;;  %v4303_v9 = vld [vmem:[%s5391_s2 + $0x68] ss:$16 sps:$4 sm:$0xff]   ;;  %v4308_v58 = vld [vmem:[%s5391_s2 + $0x84] ss:$16 sps:$4 sm:$0xff]   ;;  %v4306_v10 = vld [vmem:[%s5391_s2 + $0x80] ss:$16 sps:$4 sm:$0xff]  }
 0x6b5   : > { %v2459_v23 = vrot.slane %v2452_v19, %v5546_v7  ;;  %2883 = vmatpush1.bf16.msra.mxu1 %v4294_v1  ;;  %v4309_v12 = vld [vmem:[%s5391_s2 + $0x88] ss:$16 sps:$4 sm:$0xff]   ;;  %v4311_v13 = vld [vmem:[%s5391_s2 + $0x8c] ss:$16 sps:$4 sm:$0xff]   ;;  %v4314_v14 = vld [vmem:[%s5391_s2 + $0xa4] ss:$16 sps:$4 sm:$0xff]  }
 0x6b6   : > { %v2477_v57 = vcombine.low %v2426_v18, %v2442_v55  ;;  %v2476_v26 = vrot.slane %v2469_v21, %v5546_v7  ;;  %2884 = vmatprep.subr.bf16.mxu1 %v4302_v4  ;;  %v4317_v15 = vld [vmem:[%s5391_s2 + $0xac] ss:$16 sps:$4 sm:$0xff]   ;;  %v4312_v16 = vld [vmem:[%s5391_s2 + $0xa0] ss:$16 sps:$4 sm:$0xff]   ;;  %v4315_v17 = vld [vmem:[%s5391_s2 + $0xa8] ss:$16 sps:$4 sm:$0xff]  }
 0x6b7   : > { %v2460_v25 = vcombine.low %v2451_v22, %v2459_v23  ;;  %v4320_v18 = vld [vmem:[%s5391_s2 + $0xc4] ss:$16 sps:$4 sm:$0xff]   ;;  %v4323_v19 = vld [vmem:[%s5391_s2 + $0xcc] ss:$16 sps:$4 sm:$0xff]   ;;  %v4318_v55 = vld [vmem:[%s5391_s2 + $0xc0] ss:$16 sps:$4 sm:$0xff]  }
 0x6b8   : > { %v2484_v27 = vrot.slane %v2477_v57, %v5546_v7  ;;  %v4321_v21 = vld [vmem:[%s5391_s2 + $0xc8] ss:$16 sps:$4 sm:$0xff]   ;;  %v4326_v22 = vld [vmem:[%s5391_s2 + $0xe4] ss:$16 sps:$4 sm:$0xff]   ;;  %v4329_v23 = vld [vmem:[%s5391_s2 + $0xec] ss:$16 sps:$4 sm:$0xff]  }
 0x6b9   : > { %v2467_v28 = vrot.slane %v2460_v25, %v5550_v11  ;;  %2885 = vmatpush1.bf16.msra.mxu1 %v4300_v8  ;;  %v4324_v57 = vld [vmem:[%s5391_s2 + $0xe0] ss:$16 sps:$4 sm:$0xff]   ;;  %v4343_v51 = vld [vmem:[%s5393_s23 + $0xd8] sm:$0xff]   ;;  %v4353_v0 = vld [vmem:[%s5393_s23 + $0xa8] sm:$0xff]  }
 0x6ba   : > { %v2485_v29 = vcombine.low %v2476_v26, %v2484_v27  ;;  %2886 = vmatprep.subr.bf16.mxu1 %v4308_v58  ;;  %v4355_v1 = vld [vmem:[%s5393_s23 + $0xf0] sm:$0xff]   ;;  %v4359_v8 = vld [vmem:[%s5393_s23 + $0xf8] sm:$0xff]  }
 0x6bb   : > { %v2468_v31 = vcombine.high %v2467_v28, %v4802_v20  ;;  %v2497_v32 = vshrl.u32 %v2467_v28, 16  ;;  %v4357_v4 = vld [vmem:[%s5393_s23 + $0xb0] sm:$0xff]   ;;  %v4361_v58 = vld [vmem:[%s5393_s23 + $0xb8] sm:$0xff]  }
 0x6bc   : > { %v2492_v30 = vrot.slane %v2485_v29, %v5550_v11 }
 0x6bd   : > { %v2503_v38 = vshrl.u32 %v2468_v31, 16  ;;  %2887 = vmatpush1.bf16.msra.mxu1 %v4306_v10  ;;  %v2700_v10 = vsub.s32 0, %v5543_v5 }
 0x6be   : > { %v2498_v33 = vshrl.u32 %v2492_v30, 16  ;;  %v2493_v34 = vcombine.high %v2492_v30, %v4802_v20  ;;  %v2496_v35 = vpack.i.b16 %v2492_v30, %v2467_v28  ;;  %2888 = vmatprep.subr.bf16.mxu1 %v4314_v14  ;;  %v2704_v14 = vsub.s32 1, %v5543_v5 }
 0x6c0   : > { %v2499_v36 = vpack.i.b16 %v2498_v33, %v2497_v32  ;;  %v2502_v37 = vpack.i.b16 %v2493_v34, %v2468_v31  ;;  %v2504_v39 = vshrl.u32 %v2493_v34, 16  ;;  %v3787_v34 = vld [vmem:[%s1033_s24] ss:$0 sm:$0xff] }
 0x6c1   : > { %2889 = vmatpush1.bf16.msra.mxu1 %v4312_v16 }
 0x6c2   : > { %2506 = vrot.lane.b32.xlu1 %v2499_v36, %s4797_s21  ;;  %2508 = vrot.lane.b32.xlu0 %v2502_v37, %s4799_s16  ;;  %v2505_v7 = vpack.i.b16 %v2504_v39, %v2503_v38  ;;  %v3788_v36 = vld [vmem:[%s1036_s11] ss:$0 sm:$0xff] }
 0x6c3   : > { %2890 = vmatprep.subr.bf16.mxu1 %v4320_v18 }
 0x6c5   : > { %2891 = vmatpush1.bf16.msra.mxu1 %v4318_v55 }
 0x6c6   : > { %2510 = vrot.lane.b32.xlu1 %v2505_v7, %s4798_s5  ;;  %2892 = vmatprep.subr.bf16.mxu1 %v4326_v22  ;;  %v4330_v7 = vld [vmem:[%s5393_s23 + $0x40] sm:$0xff]  }
 0x6c9   : > { %2893 = vmatpush1.bf16.msra.mxu1 %v4324_v57 }
 0x6ca   : > { %3923 = vmatprep.subr.bf16.mxu1 %v4330_v7 }
 0x734   : > { %v2507_v11 = vpop.permute.xlu1 %2506  ;;  %v2509_v41 = vpop.permute.xlu0 %2508 }
 0x735   : > { %v2514_v40 = vsel %vm1925_vm1, %v2496_v35, %v2507_v11  ;;  %v4331_v11 = vld [vmem:[%s5393_s23 + $0xc0] sm:$0xff]  }
 0x736   : > { %v2517_v42 = vsel %vm2515_vm4, %v2514_v40, %v2509_v41  ;;  %v4332_v40 = vld [vmem:[%s5393_s23] sm:$0xff]  }
 0x737   : > { %v4333_v41 = vld [vmem:[%s5393_s23 + $0x80] sm:$0xff]  }
 0x738   : > { %v2511_v3 = vpop.permute.xlu1 %2510 }
 0x739   : > { %v2520_v43 = vsel %vm2518_vm5, %v2517_v42, %v2511_v3  ;;  %v4334_v42 = vld [vmem:[%s5393_s23 + $0x48] sm:$0xff]  }
 0x73a   : > { %4092 = vmatmul.mubr.bf16.vlgmr.msra.gmra.mrb[8].mxu0 %v2520_v43  ;;  %v4335_v3 = vld [vmem:[%s5393_s23 + $0xc8] sm:$0xff]  }
 0x73b   : > { %2951 = vmatprep.mubr.bf16.mxu0 %v4802_v20  ;;  %2920 = vmatpush1.bf16.msra.mxu0 %v4285_v47  ;;  %v3778_v20 = vld [vmem:[%s1030_s10] ss:$0 sm:$0xff]  ;;  %v4336_v43 = vld [vmem:[%s5393_s23 + $0x8] sm:$0xff]   ;;  %v4339_v47 = vld [vmem:[%s5393_s23 + $0xd0] sm:$0xff]  }
 0x73c   : > { %2921 = vmatprep.subr.bf16.mxu0 %v4293_v50  ;;  %v4342_v50 = vld [vmem:[%s5393_s23 + $0x58] sm:$0xff]  }
 0x73f   : > { %2922 = vmatpush1.bf16.msra.mxu0 %v4291_v52  ;;  %v4344_v52 = vld [vmem:[%s5393_s23 + $0x18] sm:$0xff]  }
 0x740   : > { %2923 = vmatprep.subr.bf16.mxu0 %v4299_v46  ;;  %v4354_v46 = vld [vmem:[%s5393_s23 + $0x70] sm:$0xff]  }
 0x743   : > { %2924 = vmatpush1.bf16.msra.mxu0 %v4297_v2  ;;  %v4356_v2 = vld [vmem:[%s5393_s23 + $0x30] sm:$0xff]  }
 0x744   : > { %2925 = vmatprep.subr.bf16.mxu0 %v4305_v6  ;;  %v4358_v6 = vld [vmem:[%s5393_s23 + $0x78] sm:$0xff]  }
 0x747   : > { %2926 = vmatpush1.bf16.msra.mxu0 %v4303_v9  ;;  %v4360_v9 = vld [vmem:[%s5393_s23 + $0x38] sm:$0xff]  }
 0x748   : > { %2927 = vmatprep.subr.bf16.mxu0 %v4311_v13  ;;  %v2696_v13 = vld [vmem:[%s5443_s28] sm:$0xf]  ;;  %s6061_s28 = sld [smem:[#allocation30_spill]] }
 0x749   : > { %v2701_v16 = vrot.slane %v2696_v13, %v2700_v10  ;;  %v2705_v18 = vrot.slane %v2696_v13, %v2704_v14 }
 0x74b   : > { %2928 = vmatpush1.bf16.msra.mxu0 %v4309_v12  ;;  %v2708_v12 = vsub.s32 2, %v5543_v5 }
 0x74c   : > { %2929 = vmatprep.subr.bf16.mxu0 %v4317_v15  ;;  %v2712_v15 = vsub.s32 3, %v5543_v5 }
 0x74e   : > { %p3858_p9 = scmp.ne.s32.totalorder %s6061_s28, 1 }
 0x74f   : > { %2930 = vmatpush1.bf16.msra.mxu0 %v4315_v17  ;;  %v2709_v17 = vrot.slane %v2696_v13, %v2708_v12  ;;  %s6062_s19 = sld [smem:[#allocation61_spill]] (!%p3858_p9)  ;;  %s6063_s3 = sld [smem:[#allocation62_spill]] (!%p3858_p9) }
 0x750   : > { %2931 = vmatprep.subr.bf16.mxu0 %v4323_v19  ;;  %v2713_v19 = vrot.slane %v2696_v13, %v2712_v15 }
 0x753   : > { %2932 = vmatpush1.bf16.msra.mxu0 %v4321_v21 }
 0x754   : > { %2933 = vmatprep.subr.bf16.mxu0 %v4329_v23 }
 0x757   : > { %2934 = vmatpush1.bf16.msra.mxu0 %v4327_v24 }
 0x758   : > { %3945 = vmatprep.subr.bf16.mxu0 %v4331_v11 }
 0x80d   : > { %v2627_v53 = vpop.f32.mrb[8].mxu0 }
 0x80e   : > { %v2628_v54 = vadd.f32 %v3778_v20, %v2627_v53  ;;  %v4093_v56 = vpop.f32.mrb[9].mxu0  ;;  %v4345_v20 = vld [vmem:[%s5393_s23 + $0x98] sm:$0xff]   ;;  %v4346_v53 = vld [vmem:[%s5393_s23 + $0x60] sm:$0xff]  }
 0x80f   : > { %v2630_v59 = vpop.f32.mrb[10].mxu0  ;;  %v4348_v56 = vld [vmem:[%s5393_s23 + $0x20] sm:$0xff]  }
 0x810   : > { %v5735_v61 = vadd.f32 %v4398_v60, %v2628_v54  ;;  %v4094_v62 = vpop.f32.mrb[11].mxu0  ;;  %v4347_v54 = vld [vmem:[%s5393_s23 + $0xe0] sm:$0xff]   ;;  %v4350_v60 = vld [vmem:[%s5393_s23 + $0x68] sm:$0xff]  }
 0x811   : > { %v4349_v59 = vld [vmem:[%s5393_s23 + $0xa0] sm:$0xff]   ;;  %v4351_v62 = vld [vmem:[%s5393_s23 + $0xe8] sm:$0xff]  }
 0x812   : > { %2636 = vadd.xlane.f32.xlu1 %v5735_v61  ;;  %v2639_v63 = vmul.f32 %v5735_v61, %v5735_v61 }
 0x814   : > { %2640 = vadd.xlane.f32.xlu0 %v2639_v63  ;;  %v4352_v63 = vld [vmem:[%s5393_s23 + $0x28] sm:$0xff]  }
 0x89f   : > { %v2637_v25 = vpop.xlane.xlu1 %2636 }
 0x8a0   : > { %v2638_v26 = vmul.f32 0.0078125, %v2637_v25 }
 0x8a1   : > { %v2641_v27 = vpop.xlane.xlu0 %2640 }
 0x8a2   : > { %v2643_v28 = vmul.f32 %v2638_v26, %v2638_v26  ;;  %v2642_v29 = vmul.f32 0.0078125, %v2641_v27  ;;  %v2645_v32 = vsub.f32 %v5735_v61, %v2638_v26 }
 0x8a4   : > { %v2644_v30 = vsub.f32 %v2642_v29, %v2643_v28 }
 0x8a6   : > { %v2646_v31 = vadd.f32 1e-05, %v2644_v30 }
 0x8a8   : > { %4380 = vrsqrt.f32 %v2646_v31 }
 0x8b2   : > { %v4381_v33 = vpop.eup %4380 }
 0x8b3   : > { %v2648_v35 = vmul.f32 %v4381_v33, %v2645_v32 }
 0x8b5   : > { %v2655_v37 = vmul.f32 %v3787_v34, %v2648_v35 }
 0x8b7   : > { %v2662_v38 = vadd.f32 %v3788_v36, %v2655_v37 }
 0x8b9   : > { %v2663_v39 = vpack.c.bf16 %v2662_v38, %v2662_v38 }
 0x8bb   : > { %2911 = vmatmul.mubr.bf16.vlgmr.msra.gmra.mrb[36].mxu1 %v2663_v39  ;;  %2952 = vmatmul.mubr.bf16.vlgmr.msra.gmra.mrb[12].mxu0 %v2663_v39 }
 0x8bc   : > { %3924 = vmatpush3.bf16.msra.mxu1 %v4332_v40  ;;  %3946 = vmatpush3.bf16.msra.mxu0 %v4333_v41 }
 0x8bd   : > { %3925 = vmatprep.subr.bf16.mxu1 %v4334_v42  ;;  %3947 = vmatprep.subr.bf16.mxu0 %v4335_v3 }
 0x8c0   : > { %3926 = vmatpush3.bf16.msra.mxu1 %v4336_v43  ;;  %3948 = vmatpush3.bf16.msra.mxu0 %v4337_v44 }
 0x8c1   : > { %3927 = vmatprep.subr.bf16.mxu1 %v4338_v45  ;;  %3949 = vmatprep.subr.bf16.mxu0 %v4339_v47 }
 0x8c4   : > { %3928 = vmatpush3.bf16.msra.mxu1 %v4340_v48  ;;  %3950 = vmatpush3.bf16.msra.mxu0 %v4341_v49 }
 0x8c5   : > { %3929 = vmatprep.subr.bf16.mxu1 %v4342_v50  ;;  %3951 = vmatprep.subr.bf16.mxu0 %v4343_v51 }
 0x8c8   : > { %3930 = vmatpush3.bf16.msra.mxu1 %v4344_v52  ;;  %3952 = vmatpush3.bf16.msra.mxu0 %v4345_v20 }
 0x8c9   : > { %3931 = vmatprep.subr.bf16.mxu1 %v4346_v53  ;;  %3953 = vmatprep.subr.bf16.mxu0 %v4347_v54 }
 0x8cc   : > { %3932 = vmatpush3.bf16.msra.mxu1 %v4348_v56  ;;  %3954 = vmatpush3.bf16.msra.mxu0 %v4349_v59 }
 0x8cd   : > { %3933 = vmatprep.subr.bf16.mxu1 %v4350_v60  ;;  %3955 = vmatprep.subr.bf16.mxu0 %v4351_v62  ;;  %v3825_v60 = vld [vmem:[%s1043_s25] ss:$0 sm:$0xff] }
 0x8d0   : > { %3934 = vmatpush3.bf16.msra.mxu1 %v4352_v63  ;;  %3956 = vmatpush3.bf16.msra.mxu0 %v4353_v0 }
 0x8d1   : > { %3935 = vmatprep.subr.bf16.mxu1 %v4354_v46  ;;  %3957 = vmatprep.subr.bf16.mxu0 %v4355_v1 }
 0x8d4   : > { %3936 = vmatpush3.bf16.msra.mxu1 %v4356_v2  ;;  %3958 = vmatpush3.bf16.msra.mxu0 %v4357_v4 }
 0x8d5   : > { %3937 = vmatprep.subr.bf16.mxu1 %v4358_v6  ;;  %3959 = vmatprep.subr.bf16.mxu0 %v4359_v8 }
 0x8d8   : > { %3938 = vmatpush3.bf16.msra.mxu1 %v4360_v9  ;;  %3960 = vmatpush3.bf16.msra.mxu0 %v4361_v58 }
 0x98e   : > { %v2912_v55 = vpop.f32.mrb[36].mxu1  ;;  %v2953_v21 = vpop.f32.mrb[12].mxu0 }
 0x98f   : > { %v2913_v22 = vadd.f32 %v2912_v55, %v2701_v16  ;;  %v2954_v23 = vadd.f32 %v2953_v21, %v2709_v17  ;;  %v2914_v57 = vpop.f32.mrb[37].mxu1  ;;  %v2955_v24 = vpop.f32.mrb[13].mxu0 }
 0x990   : > { %v2915_v25 = vadd.f32 %v2914_v57, %v2705_v18  ;;  %v2956_v26 = vadd.f32 %v2955_v24, %v2713_v19  ;;  %v2916_v27 = vpop.f32.mrb[38].mxu1  ;;  %v2957_v28 = vpop.f32.mrb[14].mxu0 }
 0x991   : > { %v3821_v29 = vmul.f32 -1.702, %v2913_v22  ;;  %v3823_v30 = vmul.f32 -1.702, %v2954_v23  ;;  %v2917_v31 = vpop.f32.mrb[39].mxu1  ;;  %v2958_v32 = vpop.f32.mrb[15].mxu0 }
 0x992   : > { %v3822_v33 = vmul.f32 -1.702, %v2915_v25  ;;  %v3824_v5 = vmul.f32 -1.702, %v2956_v26 }
 0x993   : > { %v2968_v34 = vmul.f32 1.442695, %v3821_v29  ;;  %v2972_v35 = vmul.f32 1.442695, %v3823_v30 }
 0x994   : > { %v2970_v36 = vmul.f32 1.442695, %v3822_v33  ;;  %v2974_v37 = vmul.f32 1.442695, %v3824_v5 }
 0x995   : > { %4382 = vpow2.f32 %v2968_v34 }
 0x996   : > { %4384 = vpow2.f32 %v2972_v35 }
 0x997   : > { %4386 = vpow2.f32 %v2970_v36 }
 0x998   : > { %4388 = vpow2.f32 %v2974_v37 }
 0x99f   : > { %v4383_v38 = vpop.eup %4382 }
 0x9a0   : > { %v4385_v39 = vpop.eup %4384  ;;  %v2976_v7 = vadd.f32 1.0, %v4383_v38 }
 0x9a1   : > { %v4387_v11 = vpop.eup %4386  ;;  %v2978_v40 = vadd.f32 1.0, %v4385_v39 }
 0x9a2   : > { %v4389_v41 = vpop.eup %4388  ;;  %4390 = vrcp.f32 %v2976_v7  ;;  %v2977_v42 = vadd.f32 1.0, %v4387_v11 }
 0x9a3   : > { %4392 = vrcp.f32 %v2978_v40  ;;  %v2979_v3 = vadd.f32 1.0, %v4389_v41 }
 0x9a4   : > { %4394 = vrcp.f32 %v2977_v42 }
 0x9a5   : > { %4396 = vrcp.f32 %v2979_v3 }
 0x9ac   : > { %v4391_v43 = vpop.eup %4390 }
 0x9ad   : > { %v4393_v44 = vpop.eup %4392  ;;  %v2988_v47 = vmul.f32 %v4391_v43, %v2913_v22  ;;  %v3860_v22 = vld [vmem:[%s6063_s3] ss:$0 sm:$0xff] (!%p3858_p9) }
 0x9ae   : > { %v4395_v45 = vpop.eup %4394  ;;  %v2990_v49 = vmul.f32 %v4393_v44, %v2954_v23 }
 0x9af   : > { %v4397_v48 = vpop.eup %4396  ;;  %v2989_v50 = vmul.f32 %v4395_v45, %v2915_v25  ;;  %v2992_v20 = vpack.c.bf16 %v2988_v47, %v2988_v47 }
 0x9b0   : > { %v2991_v51 = vmul.f32 %v4397_v48, %v2956_v26  ;;  %v2994_v54 = vpack.c.bf16 %v2990_v49, %v2990_v49 }
 0x9b1   : > { %v2993_v52 = vpack.c.bf16 %v2989_v50, %v2989_v50 }
 0x9b2   : > { %v2995_v53 = vpack.c.bf16 %v2991_v51, %v2991_v51 }
 0x9b3   : > { %3291 = vmatprep.mubr.bf16.mxu1 %v2993_v52 }
 0x9b4   : > { %3331 = vmatprep.mubr.bf16.mxu0 %v2995_v53  ;;  %3292 = vmatmul.mubr.bf16.vlgmr.msra.gmra.mrb[40].mxu1 %v2992_v20 }
 0x9b5   : > { %3332 = vmatmul.mubr.bf16.vlgmr.msra.gmra.mrb[16].mxu0 %v2994_v54 }
 0xa87   : > { %v3939_v56 = vpop.f32.mrb[40].mxu1 }
 0xa88   : > { %v3961_v59 = vpop.f32.mrb[16].mxu0  ;;  %v3940_v62 = vpop.f32.mrb[41].mxu1 }
 0xa89   : > { %v3941_v63 = vadd.f32 %v3940_v62, %v3939_v56  ;;  %v3962_v0 = vpop.f32.mrb[17].mxu0  ;;  %v3942_v46 = vpop.f32.mrb[42].mxu1 }
 0xa8a   : > { %v3963_v1 = vadd.f32 %v3962_v0, %v3961_v59  ;;  %v3964_v2 = vpop.f32.mrb[18].mxu0  ;;  %v3943_v4 = vpop.f32.mrb[43].mxu1 }
 0xa8b   : > { %v3294_v6 = vadd.f32 %v3941_v63, %v3825_v60  ;;  %v3965_v8 = vpop.f32.mrb[19].mxu0  ;;  %3344 = sbr.rel (%p3858_p9) target bundleno = 2875 (0xb3b), region = 140 }
 0xa8d   : > { %v3334_v9 = vadd.f32 %v3963_v1, %v3294_v6 }
 0xa8f   : > { %v3339_v58 = vadd.f32 %v3334_v9, %v5735_v61  ;;  %v3859_v61 = vld [vmem:[%s6062_s19] ss:$0 sm:$0xff] (!%p3858_p9) }
 0xa91   : > { %3340 = vst [vmem:[#allocation2] sm:$0xff] %v3339_v58  ;;  %3347 = vadd.xlane.f32.xlu0 (!%p3858_p9), %v3339_v58  ;;  %v3350_v10 = vmul.f32 (!%p3858_p9), %v3339_v58, %v3339_v58 }
 0xa95   : > { %3351 = vadd.xlane.f32.xlu0 %v3350_v10 }
 0xb1e   : > { %v3348_v12 = vpop.xlane.xlu0 %3347 }
 0xb1f   : > { %v3349_v13 = vmul.f32 0.0078125, %v3348_v12 }
 0xb21   : > { %v3354_v15 = vmul.f32 %v3349_v13, %v3349_v13  ;;  %v3356_v19 = vsub.f32 %v3339_v58, %v3349_v13 }
 0xb22   : > { %v3352_v14 = vpop.xlane.xlu0 %3351 }
 0xb23   : > { %v3353_v16 = vmul.f32 0.0078125, %v3352_v14 }
 0xb25   : > { %v3355_v17 = vsub.f32 %v3353_v16, %v3354_v15 }
 0xb27   : > { %v3357_v18 = vadd.f32 1e-05, %v3355_v17 }
 0xb29   : > { %4399 = vrsqrt.f32 %v3357_v18 }
 0xb33   : > { %v4400_v55 = vpop.eup %4399 }
 0xb34   : > { %v3359_v21 = vmul.f32 %v4400_v55, %v3356_v19 }
 0xb36   : > { %v3366_v23 = vmul.f32 %v3859_v61, %v3359_v21 }
 0xb38   : > { %v3373_v57 = vadd.f32 %v3860_v22, %v3366_v23 }
 0xb3a   : > { %3374 = vst [vmem:[%s1012_s14] sm:$0xff] %v3373_v57 }
 0xb3b PF: > { %s6064_s13 = sld [smem:[#allocation31_spill]]  ;;  %s6065_s6 = sld [smem:[#allocation28_spill]] }
 0xb3c   : > { %s6066_s17 = sld [smem:[#allocation41_spill]]  ;;  %s6067_s16 = sld [smem:[#allocation63_spill]] }
 0xb3d   : > { %s3389_s15 = sshll.u32 %s1012_s14, 4  ;;  %s4803_s4 = smov [#allocation17]   ;;  %s3390_s15 = int_to_ptr.vmem [resolvable:$true] %s3389_s15 }
 0xb3e   : > { %s4639_s26 = scalar_lea.vmem %s3390_s15, 128  ;;  %s4643_s2 = sshll.u32 %s4803_s4, 4  ;;  %s4644_s2 = int_to_ptr.vmem [resolvable:$false] %s4643_s2 }
 0xb3f   : > { %p4640_p7 = scmp.ne.s32.totalorder %s3390_s15, %s4639_s26  ;;  %s4645_s10 = scalar_lea.vmem %s4644_s2, 256 }
 0xb40   : > { %p4646_p12 = scmp.lt.s32.totalorder %s3390_s15, %s4644_s2  ;;  %p4647_p0 = scmp.lt.s32.totalorder %s4645_s10, %s4639_s26 }
 0xb41   : > { %s3862_s22 = sshll.u32 %s6064_s13, 7  ;;  %s6068_s18 = sand.u32 1, %s6065_s6  }
 0xb42   : > { %s5831_s27 = scalar_lea.hbm %s6067_s16, %s3862_s22  ;;  %s3376_s8 = scalar_lea.sflag [#allocation5], %s6068_s18 }
 0xb43   : > { %p6069_p4 = scmp.ne.s32.totalorder %s6066_s17, 0  ;;  %p4648_p3 = por %p4647_p0, %p4646_p12 }
 0xb45   : > { %p4641_p8 = pnand %p4640_p7, %p6069_p4 }
 0xb47   : > { %p4642_p5 = pneg %p4641_p8 }
 0xb49   : > { %p4649_p1 = pnand %p4648_p3, %p4642_p5 }
 0xb4b   : > { %4652 = shalt.err (!%p4649_p1)
}
 0xb4c   : > { %s4653_s12 = scalar_lea.hbm %s5831_s27, 128  ;;  %s4657_s29 = scalar_lea.hbm %s6067_s16, 256 }
 0xb4d   : > { %p4654_p10 = scmp.ne.s32.totalorder %s5831_s27, %s4653_s12  ;;  %p4658_p6 = scmp.lt.u32.totalorder %s5831_s27, %s6067_s16 }
 0xb4e   : > { %p4659_p2 = scmp.lt.u32.totalorder %s4657_s29, %s4653_s12  ;;  %p4661_p7 = scmp.lt.u32.totalorder %s4653_s12, %s5831_s27 }
 0xb4f   : > { %p4655_p13 = pnand %p4654_p10, %p6069_p4 }
 0xb50   : > { %p4660_p9 = por %p4659_p2, %p4658_p6 }
 0xb51   : > { %p4656_p11 = pneg %p4655_p13 }
 0xb52   : > { %p4662_p8 = por %p4661_p7, %p4660_p9 }
 0xb54   : > { %p4663_p5 = pnand %p4662_p8, %p4656_p11 }
 0xb56   : > { %4666 = shalt.err (!%p4663_p5)
}
 0xb57   : > { %4113 = dma.vmem_to_hbm [thread:$0]  (%p6069_p4), %s3390_s15, 128, %s5831_s27, %s3376_s8  }
 0xb58 PF: > { %s6070_s23 = sld [smem:[#allocation34_spill]]  ;;  %s6071_s24 = sld [smem:[#allocation27_spill]] }
 0xb59   : > { %s6072_s11 = sld [smem:[#allocation42_spill]] }
 0xb5e   : > { %p4148_p12 = scmp.ge.s32.totalorder %s6070_s23, 2  ;;  %s3401_s28 = sand.u32 1, %s6071_s24  }
 0xb5f   : > { %p6073_p0 = scmp.ne.s32.totalorder %s6072_s11, 0  ;;  %s3402_s30 = scalar_lea.sflag [#allocation5], %s3401_s28 }
 0xb61   : > { %p4142_p3 = pnand %p4148_p12, %p6073_p0 }
 0xb63   : > { %4736 = dma.done.wait (!%p4142_p3), %s3402_s30, 128  }
 0xb64   : > { %4738 = vsyncadd (!%p4142_p3), %s3402_s30, 4294967168  ;;  %s46_s4 = sadd.s32 1, %s6070_s23   ;;  %s6074_s1 = sld [smem:[#allocation25_spill]] }
 0xb65   : > { %p43_p1 = scmp.ge.s32.totalorder %s46_s4, 6   ;;  %s6075_s22 = sld [smem:[#allocation26_spill]] }
 0xb66   : > { %s6076_s23 = sld [smem:[#allocation37_spill]]  ;;  %s6077_s24 = sld [smem:[#allocation28_spill]] }
 0xb67   : > { %s6078_s2 = sld [smem:[#allocation29_spill]]  ;;  %s6079_s25 = sld [smem:[#allocation38_spill]] }
 0xb68   : > { %s6080_s3 = sld [smem:[#allocation32_spill]]  ;;  %s6081_s26 = sld [smem:[#allocation33_spill]] }
 0xb69   : > { %s6082_s27 = sld [smem:[#allocation35_spill]]  ;;  %s6083_s28 = sld [smem:[#allocation36_spill]] }
 0xb6a   :  { %45 = sbr.rel (!%p43_p1) target bundleno = 38 (0x26), region = 260 }
 0xb71   :  { %3407 = vsyncpa [#allocation4], 1 }
 0xb72   :  { %3409 = vsyncpa [#allocation4 + $0x1], 1 }
 0xb73   :  { %3410 = vsyncpa [#allocation7], 1 }
 0xb74   :  { %3412 = vsyncpa [#allocation7 + $0x1], 1 }
 0xb75   :  { %3413 = vsyncpa [#allocation10], 1 }
 0xb76   :  { %3415 = vsyncpa [#allocation10 + $0x1], 1 }
 0xb77   :  { %3416 = vsyncpa [#allocation13], 1 }
 0xb78   :  { %3418 = vsyncpa [#allocation13 + $0x1], 1 }
 0xb79   :  { %3419 = vsyncpa [#allocation16], 1 }
 0xb7a   :  { %3421 = vsyncpa [#allocation16 + $0x1], 1 }
 0xb7b   :  { %3422 = vsyncpa [#allocation5], 1 }
 0xb7c   :  { %3424 = vsyncpa [#allocation5 + $0x1], 1 }

</bundles_post_ra>
